<compile_context>
chip_gen: v6e
topology: v6e:2x2x1
jax: 0.10.0
libtpu: 0.0.40
codegen_flags: <defaults>
</compile_context>

<pallas_src>
import functools
import math

import jax
import jax.numpy as jnp
from jax.experimental import pallas as pl
from jax.experimental.pallas import tpu as pltpu

EPS = 1e-5                      # RMSNorm eps
_VMEM_LIMIT = 48 * 1024 * 1024  # safe on v5e/v6e (128 MiB) and v7x (64 MiB)
_TM = 256                       # row tile (multiple of MXU edge on all gens)


def _round_up(x, m):
    return (x + m - 1) // m * m


def _choose_k_tile(K, group, cap=512):
    """Largest contraction tile <= cap that divides K, is a multiple of the
    RMSNorm group size and lane-friendly (multiple of 128) when tiling."""
    if K <= cap:
        return K
    step = group * 128 // math.gcd(group, 128)
    t = (cap // step) * step
    while t >= step:
        if K % t == 0:
            return t
        t -= step
    return K  # fall back to a fully-resident weight block


# ---------------------------------------------------------------------------
# Kernel 1: fused RMSNorm (groups of `group` lanes) + spatial linear
# ---------------------------------------------------------------------------
def _norm_spatial_kernel(x_ref, gsum_ref, gexp_ref, w_ref, wst_ref, b_ref,
                         o_ref, acc_ref, *, inv_group):
    k = pl.program_id(1)

    @pl.when(k == 0)
    def _init():
        acc_ref[...] = jnp.zeros_like(acc_ref)

    x = x_ref[...].astype(jnp.float32)                        # (tm, tk)
    # Per-group (embed_dim) sum of squares via a 0/1 matmul -> lane dense.
    grp = jnp.dot(x * x, gsum_ref[...],
                  preferred_element_type=jnp.float32)         # (tm, n_groups)
    inv = jax.lax.rsqrt(grp * inv_group + EPS)                # 1/rms per group
    # Broadcast the per-group scale back to every lane of its group.
    scale = jnp.dot(inv, gexp_ref[...],
                    preferred_element_type=jnp.float32)       # (tm, tk)
    y = x * scale * w_ref[...].astype(jnp.float32)            # RMSNorm output
    acc_ref[...] += jnp.dot(y.astype(wst_ref.dtype), wst_ref[...],
                            preferred_element_type=jnp.float32)

    @pl.when(k == pl.num_programs(1) - 1)
    def _fin():
        o_ref[...] = (acc_ref[...] +
                      b_ref[...].astype(jnp.float32)).astype(o_ref.dtype)


def fused_rmsnorm_spatial(x2d, norm_w_full, wsT, bias, group, *, tm=_TM):
    """out = (RMSNorm over groups of `group` lanes of x2d) @ wsT + bias."""
    M, K = x2d.shape
    Kout = wsT.shape[1]
    n_groups = K // group
    tk = _choose_k_tile(K, group)

    m_pad = _round_up(M, tm)
    if m_pad != M:
        x2d = jnp.pad(x2d, ((0, m_pad - M), (0, 0)))

    # 0/1 group matrices: gsum[j, n] = 1 iff lane j belongs to group n.
    gsum = (jnp.arange(K)[:, None] // group ==
            jnp.arange(n_groups)[None, :]).astype(jnp.float32)
    gexp = gsum.T

    kernel = functools.partial(_norm_spatial_kernel, inv_group=1.0 / group)
    out = pl.pallas_call(
        kernel,
        out_shape=jax.ShapeDtypeStruct((m_pad, Kout), x2d.dtype),
        grid=(m_pad // tm, K // tk),
        in_specs=[
            pl.BlockSpec((tm, tk), lambda i, k: (i, k)),        # x rows
            pl.BlockSpec((tk, n_groups), lambda i, k: (k, 0)),  # group sum mat
            pl.BlockSpec((n_groups, tk), lambda i, k: (0, k)),  # group expand
            pl.BlockSpec((1, tk), lambda i, k: (0, k)),         # RMSNorm weight
            pl.BlockSpec((tk, Kout), lambda i, k: (k, 0)),      # Ws^T chunk
            pl.BlockSpec((1, Kout), lambda i, k: (0, 0)),       # bias
        ],
        out_specs=pl.BlockSpec((tm, Kout), lambda i, k: (i, 0)),
        scratch_shapes=[pltpu.VMEM((tm, Kout), jnp.float32)],
        compiler_params=pltpu.CompilerParams(
            dimension_semantics=("parallel", "arbitrary"),
            vmem_limit_bytes=_VMEM_LIMIT,
        ),
    )(x2d, gsum, gexp, norm_w_full, wsT, bias.reshape(1, Kout))
    return out[:M]


# ---------------------------------------------------------------------------
# Kernel 2: plain linear  y = x @ wT + b  (K-tiled, f32 accumulator)
# ---------------------------------------------------------------------------
def _linear_kernel(x_ref, w_ref, b_ref, o_ref, acc_ref):
    k = pl.program_id(1)

    @pl.when(k == 0)
    def _init():
        acc_ref[...] = jnp.zeros_like(acc_ref)

    acc_ref[...] += jnp.dot(x_ref[...], w_ref[...],
                            preferred_element_type=jnp.float32)

    @pl.when(k == pl.num_programs(1) - 1)
    def _fin():
        o_ref[...] = (acc_ref[...] +
                      b_ref[...].astype(jnp.float32)).astype(o_ref.dtype)


def linear(x2d, wT, bias, *, tm=_TM):
    M, K = x2d.shape
    Kout = wT.shape[1]
    tk = _choose_k_tile(K, 1)

    m_pad = _round_up(M, tm)
    if m_pad != M:
        x2d = jnp.pad(x2d, ((0, m_pad - M), (0, 0)))

    out = pl.pallas_call(
        _linear_kernel,
        out_shape=jax.ShapeDtypeStruct((m_pad, Kout), x2d.dtype),
        grid=(m_pad // tm, K // tk),
        in_specs=[
            pl.BlockSpec((tm, tk), lambda i, k: (i, k)),
            pl.BlockSpec((tk, Kout), lambda i, k: (k, 0)),
            pl.BlockSpec((1, Kout), lambda i, k: (0, 0)),
        ],
        out_specs=pl.BlockSpec((tm, Kout), lambda i, k: (i, 0)),
        scratch_shapes=[pltpu.VMEM((tm, Kout), jnp.float32)],
        compiler_params=pltpu.CompilerParams(
            dimension_semantics=("parallel", "arbitrary"),
            vmem_limit_bytes=_VMEM_LIMIT,
        ),
    )(x2d, wT, bias.reshape(1, Kout))
    return out[:M]


# ---------------------------------------------------------------------------
# Parameter init (deterministic, mirrors nn.Linear / RMSNorm shapes)
# ---------------------------------------------------------------------------
def init_params(key, num_nalls, node_num, embed_dim, horizon):
    ND = node_num * embed_dim
    TD = horizon * embed_dim
    params = []
    for _ in range(num_nalls):
        k1, k2, k3, k4, key = jax.random.split(key, 5)
        ls = 1.0 / jnp.sqrt(ND)
        lt = 1.0 / jnp.sqrt(TD)
        Ws = jax.random.uniform(k1, (ND, ND), jnp.float32, -ls, ls)  # (out, in)
        bs = jax.random.uniform(k2, (ND,), jnp.float32, -ls, ls)
        Wt = jax.random.uniform(k3, (TD, TD), jnp.float32, -lt, lt)
        bt = jax.random.uniform(k4, (TD,), jnp.float32, -lt, lt)
        params.append((Ws, bs, Wt, bt))
    norm_w = jnp.ones((embed_dim,), jnp.float32)  # RMSNorm weight init = ones
    return params, norm_w


# ---------------------------------------------------------------------------
# MLRF forward (Pallas-backed)
# ---------------------------------------------------------------------------
@functools.partial(jax.jit, static_argnums=(3, 4))
def mlrf_forward(x, params, norm_w, node_num, embed_dim):
    B, T, E = x.shape
    N, D = node_num, embed_dim
    TD = T * D
    assert E == N * D

    # The PyTorch loop recomputes `output` from the *original* x each iteration
    # and overwrites it, so only the last params tuple affects the result;
    # earlier iterations are dead compute and are skipped (identical output).
    Ws, bs, Wt, bt = params[-1]

    norm_w_full = jnp.tile(norm_w, N).reshape(1, E)  # RMSNorm weight over lanes

    # Fused RMSNorm + spatial linear: one pallas_call, norm output stays in VMEM.
    z = fused_rmsnorm_spatial(x.reshape(B * T, E), norm_w_full, Ws.T, bs, D)

    # (B, T, N, D) -> (B, N, T*D) for the temporal linear.
    # TODO(synk): fold this (T, N) re-interleave into the temporal kernel's
    # index_map / an in-VMEM relayout to drop one HBM round trip.
    zt = z.reshape(B, T, N, D).transpose(0, 2, 1, 3).reshape(B * N, TD)

    u = linear(zt, Wt.T, bt)  # temporal linear

    # PyTorch: (B, N, T*D).transpose(1, 2).reshape(B, T, N, D).reshape(B, T, E)
    out = u.reshape(B, N, TD).transpose(0, 2, 1).reshape(B, T, E)
    return out


# ---------------------------------------------------------------------------
# Pure-JAX reference (full loop, exactly as the PyTorch module)
# ---------------------------------------------------------------------------
def mlrf_ref(x, params, norm_w, node_num, embed_dim):
    B, T, E = x.shape
    N, D = node_num, embed_dim
    x4 = x.reshape(B, T, N, D)
    output = None
    for (Ws, bs, Wt, bt) in params:
        ms = jnp.mean(x4 * x4, axis=-1, keepdims=True)
        out = x4 * jax.lax.rsqrt(ms + EPS) * norm_w
        out = out.reshape(B, T, N * D) @ Ws.T + bs
        out = out.reshape(B, T, N, D).transpose(0, 2, 1, 3).reshape(B, N, T * D)
        out = out @ Wt.T + bt
        out = out.transpose(0, 2, 1).reshape(B, T, N, D)
        output = out
    return output.reshape(B, T, E)


if __name__ == "__main__":
    # Small shapes consistent with the module:
    # batch=2, horizon(T)=8, node_num(N)=4, embed_dim(D)=8 -> E = N*D = 32
    B, T, N, D = 2, 8, 4, 8
    num_nalls = 2

    key = jax.random.PRNGKey(0)
    kx, kp = jax.random.split(key)
    x = jax.random.normal(kx, (B, T, N * D), jnp.float32)
    params, norm_w = init_params(kp, num_nalls, N, D, T)

    y = mlrf_forward(x, params, norm_w, N, D)
    y = jax.block_until_ready(y)

    y_ref = mlrf_ref(x, params, norm_w, N, D)
    assert y.shape == (B, T, N * D)
    assert jnp.allclose(y, y_ref, atol=1e-4, rtol=1e-4), "mismatch vs reference"

    print("KERNEL_OK")
</pallas_src>

<mosaic_0001>
module attributes {stable_mosaic.version = 11 : i64} {
  func.func @_norm_spatial_kernel(%arg0: i32, %arg1: i32, %arg2: memref<256x32xf32, #tpu.memory_space<vmem>>, %arg3: memref<32x4xf32, #tpu.memory_space<vmem>>, %arg4: memref<4x32xf32, #tpu.memory_space<vmem>>, %arg5: memref<1x32xf32, #tpu.memory_space<vmem>>, %arg6: memref<32x32xf32, #tpu.memory_space<vmem>>, %arg7: memref<1x32xf32, #tpu.memory_space<vmem>>, %arg8: memref<256x32xf32, #tpu.memory_space<vmem>>, %arg9: memref<256x32xf32, #tpu.memory_space<vmem>>) attributes {dimension_semantics = [#tpu.dimension_semantics<parallel>, #tpu.dimension_semantics<arbitrary>], iteration_bounds = array<i64: 1, 1>, scalar_prefetch = 0 : i64, scratch_operands = 1 : i64, tpu.core_type = #tpu.core_type<tc>, window_params = [{transform_indices = @transform_0, window_bounds = array<i64: 256, 32>}, {transform_indices = @transform_1, window_bounds = array<i64: 32, 4>}, {transform_indices = @transform_2, window_bounds = array<i64: 4, 32>}, {transform_indices = @transform_3, window_bounds = array<i64: 1, 32>}, {transform_indices = @transform_4, window_bounds = array<i64: 32, 32>}, {pipeline_mode = #tpu.pipeline_mode<synchronous>, transform_indices = @transform_5, window_bounds = array<i64: 1, 32>}, {transform_indices = @transform_6, window_bounds = array<i64: 256, 32>}]} {
    %c0_i32 = arith.constant 0 : i32
    %0 = arith.cmpi eq, %arg1, %c0_i32 : i32
    %1 = arith.extui %0 : i1 to i32
    %c0_i32_0 = arith.constant 0 : i32
    %2 = arith.cmpi ne, %1, %c0_i32_0 : i32
    scf.if %2 {
      %cst_20 = arith.constant 0.000000e+00 : f32
      %26 = vector.broadcast %cst_20 : f32 to vector<256x32xf32>
      %c0_21 = arith.constant 0 : index
      %c0_22 = arith.constant 0 : index
      %27 = vector.load %arg9[%c0_21, %c0_22] : memref<256x32xf32, #tpu.memory_space<vmem>>, vector<256x32xf32>
      tpu.vector_store %arg9[%c0_21, %c0_22], %26 {strides = array<i32>} : memref<256x32xf32, #tpu.memory_space<vmem>>, vector<256x32xf32>,
    } else {
    }
    %c0 = arith.constant 0 : index
    %c0_1 = arith.constant 0 : index
    %3 = vector.load %arg2[%c0, %c0_1] : memref<256x32xf32, #tpu.memory_space<vmem>>, vector<256x32xf32>
    %4 = arith.mulf %3, %3 : vector<256x32xf32>
    %c0_2 = arith.constant 0 : index
    %c0_3 = arith.constant 0 : index
    %5 = vector.load %arg3[%c0_2, %c0_3] : memref<32x4xf32, #tpu.memory_space<vmem>>, vector<32x4xf32>
    %cst = arith.constant dense<0.000000e+00> : vector<256x4xf32>
    %6 = tpu.matmul %4, %5, %cst {dimension_numbers = #tpu.dot_dimension_numbers<[1], [0], [0], [1], [0, 0, 1, 1], [], []>} : vector<256x32xf32>, vector<32x4xf32>, vector<256x4xf32> -> vector<256x4xf32>
    %cst_4 = arith.constant 1.250000e-01 : f32
    %7 = vector.broadcast %cst_4 : f32 to vector<256x4xf32>
    %8 = arith.mulf %6, %7 : vector<256x4xf32>
    %cst_5 = arith.constant 9.99999974E-6 : f32
    %9 = vector.broadcast %cst_5 : f32 to vector<256x4xf32>
    %10 = arith.addf %8, %9 : vector<256x4xf32>
    %11 = math.rsqrt %10 : vector<256x4xf32>
    %c0_6 = arith.constant 0 : index
    %c0_7 = arith.constant 0 : index
    %12 = vector.load %arg4[%c0_6, %c0_7] : memref<4x32xf32, #tpu.memory_space<vmem>>, vector<4x32xf32>
    %cst_8 = arith.constant dense<0.000000e+00> : vector<256x32xf32>
    %13 = tpu.matmul %11, %12, %cst_8 {dimension_numbers = #tpu.dot_dimension_numbers<[1], [0], [0], [1], [0, 0, 1, 1], [], []>} : vector<256x4xf32>, vector<4x32xf32>, vector<256x32xf32> -> vector<256x32xf32>
    %14 = arith.mulf %3, %13 : vector<256x32xf32>
    %c0_9 = arith.constant 0 : index
    %c0_10 = arith.constant 0 : index
    %15 = vector.load %arg5[%c0_9, %c0_10] : memref<1x32xf32, #tpu.memory_space<vmem>>, vector<1x32xf32>
    %16 = vector.broadcast %15 : vector<1x32xf32> to vector<256x32xf32>
    %17 = arith.mulf %14, %16 : vector<256x32xf32>
    %c0_11 = arith.constant 0 : index
    %c0_12 = arith.constant 0 : index
    %18 = vector.load %arg9[%c0_11, %c0_12] : memref<256x32xf32, #tpu.memory_space<vmem>>, vector<256x32xf32>
    %c0_13 = arith.constant 0 : index
    %c0_14 = arith.constant 0 : index
    %19 = vector.load %arg6[%c0_13, %c0_14] : memref<32x32xf32, #tpu.memory_space<vmem>>, vector<32x32xf32>
    %cst_15 = arith.constant dense<0.000000e+00> : vector<256x32xf32>
    %20 = tpu.matmul %17, %19, %cst_15 {dimension_numbers = #tpu.dot_dimension_numbers<[1], [0], [0], [1], [0, 0, 1, 1], [], []>} : vector<256x32xf32>, vector<32x32xf32>, vector<256x32xf32> -> vector<256x32xf32>
    %21 = arith.addf %18, %20 : vector<256x32xf32>
    %c0_16 = arith.constant 0 : index
    %c0_17 = arith.constant 0 : index
    %22 = vector.load %arg9[%c0_16, %c0_17] : memref<256x32xf32, #tpu.memory_space<vmem>>, vector<256x32xf32>
    tpu.vector_store %arg9[%c0_16, %c0_17], %21 {strides = array<i32>} : memref<256x32xf32, #tpu.memory_space<vmem>>, vector<256x32xf32>,
    %c0_i32_18 = arith.constant 0 : i32
    %23 = arith.cmpi eq, %arg1, %c0_i32_18 : i32
    %24 = arith.extui %23 : i1 to i32
    %c0_i32_19 = arith.constant 0 : i32
    %25 = arith.cmpi ne, %24, %c0_i32_19 : i32
    scf.if %25 {
      %c0_20 = arith.constant 0 : index
      %c0_21 = arith.constant 0 : index
      %26 = vector.load %arg9[%c0_20, %c0_21] : memref<256x32xf32, #tpu.memory_space<vmem>>, vector<256x32xf32>
      %c0_22 = arith.constant 0 : index
      %c0_23 = arith.constant 0 : index
      %27 = vector.load %arg7[%c0_22, %c0_23] : memref<1x32xf32, #tpu.memory_space<vmem>>, vector<1x32xf32>
      %28 = vector.broadcast %27 : vector<1x32xf32> to vector<256x32xf32>
      %29 = arith.addf %26, %28 : vector<256x32xf32>
      %c0_24 = arith.constant 0 : index
      %c0_25 = arith.constant 0 : index
      %30 = vector.load %arg8[%c0_24, %c0_25] : memref<256x32xf32, #tpu.memory_space<vmem>>, vector<256x32xf32>
      tpu.vector_store %arg8[%c0_24, %c0_25], %29 {strides = array<i32>} : memref<256x32xf32, #tpu.memory_space<vmem>>, vector<256x32xf32>,
    } else {
    }
    return
  }
  func.func @transform_0(%arg0: i32, %arg1: i32) -> (i32, i32) {
    %c0_i32 = arith.constant 0 : i32
    return %arg0, %arg1 : i32, i32
  }
  func.func @transform_1(%arg0: i32, %arg1: i32) -> (i32, i32) {
    %c0_i32 = arith.constant 0 : i32
    %c0_i32_0 = arith.constant 0 : i32
    return %arg1, %c0_i32 : i32, i32
  }
  func.func @transform_2(%arg0: i32, %arg1: i32) -> (i32, i32) {
    %c0_i32 = arith.constant 0 : i32
    %c0_i32_0 = arith.constant 0 : i32
    return %c0_i32, %arg1 : i32, i32
  }
  func.func @transform_3(%arg0: i32, %arg1: i32) -> (i32, i32) {
    %c0_i32 = arith.constant 0 : i32
    %c0_i32_0 = arith.constant 0 : i32
    return %c0_i32, %arg1 : i32, i32
  }
  func.func @transform_4(%arg0: i32, %arg1: i32) -> (i32, i32) {
    %c0_i32 = arith.constant 0 : i32
    %c0_i32_0 = arith.constant 0 : i32
    return %arg1, %c0_i32 : i32, i32
  }
  func.func @transform_5(%arg0: i32, %arg1: i32) -> (i32, i32) {
    %c0_i32 = arith.constant 0 : i32
    %c0_i32_0 = arith.constant 0 : i32
    %c0_i32_1 = arith.constant 0 : i32
    return %c0_i32, %c0_i32_0 : i32, i32
  }
  func.func @transform_6(%arg0: i32, %arg1: i32) -> (i32, i32) {
    %c0_i32 = arith.constant 0 : i32
    %c0_i32_0 = arith.constant 0 : i32
    return %arg0, %c0_i32 : i32, i32
  }
}

module attributes {stable_mosaic.version = 11 : i64} {
  func.func @_linear_kernel(%arg0: i32, %arg1: i32, %arg2: memref<256x64xf32, #tpu.memory_space<vmem>>, %arg3: memref<64x64xf32, #tpu.memory_space<vmem>>, %arg4: memref<1x64xf32, #tpu.memory_space<vmem>>, %arg5: memref<256x64xf32, #tpu.memory_space<vmem>>, %arg6: memref<256x64xf32, #tpu.memory_space<vmem>>) attributes {dimension_semantics = [#tpu.dimension_semantics<parallel>, #tpu.dimension_semantics<arbitrary>], iteration_bounds = array<i64: 1, 1>, scalar_prefetch = 0 : i64, scratch_operands = 1 : i64, tpu.core_type = #tpu.core_type<tc>, window_params = [{transform_indices = @transform_0, window_bounds = array<i64: 256, 64>}, {transform_indices = @transform_1, window_bounds = array<i64: 64, 64>}, {pipeline_mode = #tpu.pipeline_mode<synchronous>, transform_indices = @transform_2, window_bounds = array<i64: 1, 64>}, {transform_indices = @transform_3, window_bounds = array<i64: 256, 64>}]} {
    %c0_i32 = arith.constant 0 : i32
    %0 = arith.cmpi eq, %arg1, %c0_i32 : i32
    %1 = arith.extui %0 : i1 to i32
    %c0_i32_0 = arith.constant 0 : i32
    %2 = arith.cmpi ne, %1, %c0_i32_0 : i32
    scf.if %2 {
      %cst_10 = arith.constant 0.000000e+00 : f32
      %12 = vector.broadcast %cst_10 : f32 to vector<256x64xf32>
      %c0_11 = arith.constant 0 : index
      %c0_12 = arith.constant 0 : index
      %13 = vector.load %arg6[%c0_11, %c0_12] : memref<256x64xf32, #tpu.memory_space<vmem>>, vector<256x64xf32>
      tpu.vector_store %arg6[%c0_11, %c0_12], %12 {strides = array<i32>} : memref<256x64xf32, #tpu.memory_space<vmem>>, vector<256x64xf32>,
    } else {
    }
    %c0 = arith.constant 0 : index
    %c0_1 = arith.constant 0 : index
    %3 = vector.load %arg6[%c0, %c0_1] : memref<256x64xf32, #tpu.memory_space<vmem>>, vector<256x64xf32>
    %c0_2 = arith.constant 0 : index
    %c0_3 = arith.constant 0 : index
    %4 = vector.load %arg2[%c0_2, %c0_3] : memref<256x64xf32, #tpu.memory_space<vmem>>, vector<256x64xf32>
    %c0_4 = arith.constant 0 : index
    %c0_5 = arith.constant 0 : index
    %5 = vector.load %arg3[%c0_4, %c0_5] : memref<64x64xf32, #tpu.memory_space<vmem>>, vector<64x64xf32>
    %cst = arith.constant dense<0.000000e+00> : vector<256x64xf32>
    %6 = tpu.matmul %4, %5, %cst {dimension_numbers = #tpu.dot_dimension_numbers<[1], [0], [0], [1], [0, 0, 1, 1], [], []>} : vector<256x64xf32>, vector<64x64xf32>, vector<256x64xf32> -> vector<256x64xf32>
    %7 = arith.addf %3, %6 : vector<256x64xf32>
    %c0_6 = arith.constant 0 : index
    %c0_7 = arith.constant 0 : index
    %8 = vector.load %arg6[%c0_6, %c0_7] : memref<256x64xf32, #tpu.memory_space<vmem>>, vector<256x64xf32>
    tpu.vector_store %arg6[%c0_6, %c0_7], %7 {strides = array<i32>} : memref<256x64xf32, #tpu.memory_space<vmem>>, vector<256x64xf32>,
    %c0_i32_8 = arith.constant 0 : i32
    %9 = arith.cmpi eq, %arg1, %c0_i32_8 : i32
    %10 = arith.extui %9 : i1 to i32
    %c0_i32_9 = arith.constant 0 : i32
    %11 = arith.cmpi ne, %10, %c0_i32_9 : i32
    scf.if %11 {
      %c0_10 = arith.constant 0 : index
      %c0_11 = arith.constant 0 : index
      %12 = vector.load %arg6[%c0_10, %c0_11] : memref<256x64xf32, #tpu.memory_space<vmem>>, vector<256x64xf32>
      %c0_12 = arith.constant 0 : index
      %c0_13 = arith.constant 0 : index
      %13 = vector.load %arg4[%c0_12, %c0_13] : memref<1x64xf32, #tpu.memory_space<vmem>>, vector<1x64xf32>
      %14 = vector.broadcast %13 : vector<1x64xf32> to vector<256x64xf32>
      %15 = arith.addf %12, %14 : vector<256x64xf32>
      %c0_14 = arith.constant 0 : index
      %c0_15 = arith.constant 0 : index
      %16 = vector.load %arg5[%c0_14, %c0_15] : memref<256x64xf32, #tpu.memory_space<vmem>>, vector<256x64xf32>
      tpu.vector_store %arg5[%c0_14, %c0_15], %15 {strides = array<i32>} : memref<256x64xf32, #tpu.memory_space<vmem>>, vector<256x64xf32>,
    } else {
    }
    return
  }
  func.func @transform_0(%arg0: i32, %arg1: i32) -> (i32, i32) {
    %c0_i32 = arith.constant 0 : i32
    return %arg0, %arg1 : i32, i32
  }
  func.func @transform_1(%arg0: i32, %arg1: i32) -> (i32, i32) {
    %c0_i32 = arith.constant 0 : i32
    %c0_i32_0 = arith.constant 0 : i32
    return %arg1, %c0_i32 : i32, i32
  }
  func.func @transform_2(%arg0: i32, %arg1: i32) -> (i32, i32) {
    %c0_i32 = arith.constant 0 : i32
    %c0_i32_0 = arith.constant 0 : i32
    %c0_i32_1 = arith.constant 0 : i32
    return %c0_i32, %c0_i32_0 : i32, i32
  }
  func.func @transform_3(%arg0: i32, %arg1: i32) -> (i32, i32) {
    %c0_i32 = arith.constant 0 : i32
    %c0_i32_0 = arith.constant 0 : i32
    return %arg0, %c0_i32 : i32, i32
  }
}

</mosaic_0001>

<bundles_post_ra>
// kernel: tile.9
= control target key start
LH: loop header
LB: loop body
LE: loop exit
PB: predicated region body
PF: predicated region fallthrough
CT: control target
= control target key end

     0   :  { %vm8_vm0 = vcmask 64512   ;;  %s40_s8 = smov 8   ;;  %s41_s9 = smov 16   ;;  %vm14_vm1 = vcmask 261312   ;;  %vm20_vm2 = vcmask 195712   ;;  %vm26_vm3 = vcmask 130112   ;;  %s58_s0 = inlined_call_operand.vmem [shape: f32[4,8], index: 0, kind: input, shape index: {}]   ;;  %s59_s1 = inlined_call_operand.vmem [shape: f32[1,32], index: 1, kind: output, shape index: {}]  }
   0x1   :  { %v5_v0 = vld [vmem:[%s58_s0] sm:$0xf]  ;;  %s39_s0 = smov 24  }
   0x2   :  { %6 = vst [vmem:[#allocation1] sm:$0xf] %v5_v0 }
   0x9   :  { %v11_v1 = vld [vmem:[#allocation1 + $0x3] sm:$0x1]   ;;  %v23_v2 = vld [vmem:[#allocation1 + $0x1] sm:$0x1]   ;;  %v7_v3 = vld [vmem:[#allocation1] sm:$0x1]  }
   0xa   :  { %12 = vrot.lane.b32.xlu0 %v11_v1, %s39_s0  ;;  %24 = vrot.lane.b32.xlu1 %v23_v2, %s40_s8  ;;  %v17_v4 = vld [vmem:[#allocation1 + $0x2] sm:$0x1]   ;;  %9 = vst.msk [vmem:[#allocation0] sm:$0x1] %vm8_vm0, %v7_v3  }
   0xe   :  { %18 = vrot.lane.b32.xlu0 %v17_v4, %s41_s9 }
  0x7c   :  { %v13_v5 = vpop.permute.xlu0 %12   ;;  %v25_v6 = vpop.permute.xlu1 %24  }
  0x7d   :  { %15 = vst.msk [vmem:[#allocation0] sm:$0x1] %vm14_vm1, %v13_v5  }
  0x80   :  { %v19_v7 = vpop.permute.xlu0 %18  }
  0x81   :  { %21 = vst.msk [vmem:[#allocation0] sm:$0x1] %vm20_vm2, %v19_v7  }
  0x82   :  { %27 = vst.msk [vmem:[#allocation0] sm:$0x1] %vm26_vm3, %v25_v6  }
  0x89   :  { %v32_v8 = vld [vmem:[#allocation0] sm:$0x1] }
  0x8a   :  { %35 = vst [vmem:[%s59_s1] sm:$0x1] %v32_v8 }

// kernel: tile.8
= control target key start
LH: loop header
LB: loop body
LE: loop exit
PB: predicated region body
PF: predicated region fallthrough
CT: control target
= control target key end

     0   :  { %s22_s0 = inlined_call_operand.vmem [shape: f32[8], index: 0, kind: input, shape index: {}]   ;;  %s23_s1 = inlined_call_operand.vmem [shape: f32[4,8], index: 1, kind: output, shape index: {}]  }
   0x1   :  { %v4_v0 = vld [vmem:[%s22_s0] ss:$0 sm:$0xff] }
   0x2   :  { %5 = vst [vmem:[%s23_s1] sm:$0xf] %v4_v0 }

// kernel: mlrf_forward.3
= control target key start
LH: loop header
LB: loop body
LE: loop exit
PB: predicated region body
PF: predicated region fallthrough
CT: control target
= control target key end

     0   :  { %vm18_vm0 = vcmask 523264   ;;  %v773_v2 = vmov 0.0   ;;  %s1175_s1 = inlined_call_operand.vmem [shape: f32[64,64], index: 1, kind: input, shape index: {}]   ;;  %s1176_s0 = inlined_call_operand.vmem [shape: f32[256,64], index: 0, kind: input, shape index: {}]   ;;  %s1177_s2 = inlined_call_operand.vmem [shape: f32[1,64], index: 2, kind: input, shape index: {}]   ;;  %s1178_s3 = inlined_call_operand.vmem [shape: f32[256,64], index: 3, kind: output, shape index: {}]  }
   0x1   :  { %v122_v0 = vld [vmem:[%s1175_s1 + $0x38] sm:$0xff]  ;;  %v121_v1 = vld [vmem:[%s1175_s1 + $0x30] sm:$0xff]  ;;  %20 = vst.msk [vmem:[#allocation2 + $0x8] sm:$0xff] %vm18_vm0, %v773_v2  ;;  %19 = vst.msk [vmem:[#allocation2] sm:$0xff] %vm18_vm0, %v773_v2 }
   0x2   :  { %21 = vst.msk [vmem:[#allocation2 + $0x10] sm:$0xff] %vm18_vm0, %v773_v2  ;;  %22 = vst.msk [vmem:[#allocation2 + $0x18] sm:$0xff] %vm18_vm0, %v773_v2  ;;  %692 = vmatprep.subr.mxu0 %v122_v0  ;;  %756 = vmatprep.subr.mxu1 %v122_v0  ;;  %v120_v3 = vld [vmem:[%s1175_s1 + $0x28] sm:$0xff]  ;;  %v119_v4 = vld [vmem:[%s1175_s1 + $0x20] sm:$0xff] }
   0x3   :  { %23 = vst.msk [vmem:[#allocation2 + $0x20] sm:$0xff] %vm18_vm0, %v773_v2  ;;  %24 = vst.msk [vmem:[#allocation2 + $0x28] sm:$0xff] %vm18_vm0, %v773_v2  ;;  %693 = vmatpush3.msra.mxu0 %v122_v0  ;;  %764 = vmatpush3.msra.mxu1 %v122_v0  ;;  %v118_v5 = vld [vmem:[%s1175_s1 + $0x18] sm:$0xff]  ;;  %v117_v6 = vld [vmem:[%s1175_s1 + $0x10] sm:$0xff] }
   0x4   :  { %25 = vst.msk [vmem:[#allocation2 + $0x30] sm:$0xff] %vm18_vm0, %v773_v2  ;;  %26 = vst.msk [vmem:[#allocation2 + $0x38] sm:$0xff] %vm18_vm0, %v773_v2  ;;  %694 = vmatprep.subr.mxu0 %v121_v1  ;;  %757 = vmatprep.subr.mxu1 %v121_v1  ;;  %v116_v7 = vld [vmem:[%s1175_s1 + $0x8] sm:$0xff]  ;;  %v115_v8 = vld [vmem:[%s1175_s1] sm:$0xff] }
   0x5   :  { %27 = vst.msk [vmem:[#allocation2 + $0x40] sm:$0xff] %vm18_vm0, %v773_v2  ;;  %28 = vst.msk [vmem:[#allocation2 + $0x48] sm:$0xff] %vm18_vm0, %v773_v2  ;;  %695 = vmatpush3.msra.mxu0 %v121_v1  ;;  %765 = vmatpush3.msra.mxu1 %v121_v1  ;;  %v83_v9 = vld [vmem:[%s1176_s0] sm:$0xff]  ;;  %v84_v11 = vld [vmem:[%s1176_s0 + $0x8] sm:$0xff] }
   0x6   :  { %29 = vst.msk [vmem:[#allocation2 + $0x50] sm:$0xff] %vm18_vm0, %v773_v2  ;;  %30 = vst.msk [vmem:[#allocation2 + $0x58] sm:$0xff] %vm18_vm0, %v773_v2  ;;  %696 = vmatprep.subr.mxu0 %v120_v3  ;;  %758 = vmatprep.subr.mxu1 %v120_v3  ;;  %v99_v10 = vld [vmem:[%s1176_s0 + $0x80] sm:$0xff]  ;;  %v100_v12 = vld [vmem:[%s1176_s0 + $0x88] sm:$0xff] }
   0x7   :  { %31 = vst.msk [vmem:[#allocation2 + $0x60] sm:$0xff] %vm18_vm0, %v773_v2  ;;  %32 = vst.msk [vmem:[#allocation2 + $0x68] sm:$0xff] %vm18_vm0, %v773_v2  ;;  %697 = vmatpush3.msra.mxu0 %v120_v3  ;;  %766 = vmatpush3.msra.mxu1 %v120_v3  ;;  %v85_v13 = vld [vmem:[%s1176_s0 + $0x10] sm:$0xff]  ;;  %v86_v15 = vld [vmem:[%s1176_s0 + $0x18] sm:$0xff] }
   0x8   :  { %33 = vst.msk [vmem:[#allocation2 + $0x70] sm:$0xff] %vm18_vm0, %v773_v2  ;;  %34 = vst.msk [vmem:[#allocation2 + $0x78] sm:$0xff] %vm18_vm0, %v773_v2  ;;  %698 = vmatprep.subr.mxu0 %v119_v4  ;;  %759 = vmatprep.subr.mxu1 %v119_v4  ;;  %v101_v14 = vld [vmem:[%s1176_s0 + $0x90] sm:$0xff]  ;;  %v102_v16 = vld [vmem:[%s1176_s0 + $0x98] sm:$0xff] }
   0x9   :  { %35 = vst.msk [vmem:[#allocation2 + $0x80] sm:$0xff] %vm18_vm0, %v773_v2  ;;  %36 = vst.msk [vmem:[#allocation2 + $0x88] sm:$0xff] %vm18_vm0, %v773_v2  ;;  %699 = vmatpush3.msra.mxu0 %v119_v4  ;;  %767 = vmatpush3.msra.mxu1 %v119_v4  ;;  %v87_v17 = vld [vmem:[%s1176_s0 + $0x20] sm:$0xff]  ;;  %v88_v19 = vld [vmem:[%s1176_s0 + $0x28] sm:$0xff] }
   0xa   :  { %37 = vst.msk [vmem:[#allocation2 + $0x90] sm:$0xff] %vm18_vm0, %v773_v2  ;;  %38 = vst.msk [vmem:[#allocation2 + $0x98] sm:$0xff] %vm18_vm0, %v773_v2  ;;  %700 = vmatprep.subr.mxu0 %v118_v5  ;;  %760 = vmatprep.subr.mxu1 %v118_v5  ;;  %v103_v18 = vld [vmem:[%s1176_s0 + $0xa0] sm:$0xff]  ;;  %v104_v20 = vld [vmem:[%s1176_s0 + $0xa8] sm:$0xff] }
   0xb   :  { %39 = vst.msk [vmem:[#allocation2 + $0xa0] sm:$0xff] %vm18_vm0, %v773_v2  ;;  %40 = vst.msk [vmem:[#allocation2 + $0xa8] sm:$0xff] %vm18_vm0, %v773_v2  ;;  %701 = vmatpush3.msra.mxu0 %v118_v5  ;;  %768 = vmatpush3.msra.mxu1 %v118_v5  ;;  %v89_v21 = vld [vmem:[%s1176_s0 + $0x30] sm:$0xff]  ;;  %v90_v23 = vld [vmem:[%s1176_s0 + $0x38] sm:$0xff] }
   0xc   :  { %41 = vst.msk [vmem:[#allocation2 + $0xb0] sm:$0xff] %vm18_vm0, %v773_v2  ;;  %42 = vst.msk [vmem:[#allocation2 + $0xb8] sm:$0xff] %vm18_vm0, %v773_v2  ;;  %702 = vmatprep.subr.mxu0 %v117_v6  ;;  %761 = vmatprep.subr.mxu1 %v117_v6  ;;  %v105_v22 = vld [vmem:[%s1176_s0 + $0xb0] sm:$0xff]  ;;  %v106_v24 = vld [vmem:[%s1176_s0 + $0xb8] sm:$0xff] }
   0xd   :  { %43 = vst.msk [vmem:[#allocation2 + $0xc0] sm:$0xff] %vm18_vm0, %v773_v2  ;;  %44 = vst.msk [vmem:[#allocation2 + $0xc8] sm:$0xff] %vm18_vm0, %v773_v2  ;;  %703 = vmatpush3.msra.mxu0 %v117_v6  ;;  %769 = vmatpush3.msra.mxu1 %v117_v6  ;;  %v91_v25 = vld [vmem:[%s1176_s0 + $0x40] sm:$0xff]  ;;  %v92_v27 = vld [vmem:[%s1176_s0 + $0x48] sm:$0xff] }
   0xe   :  { %45 = vst.msk [vmem:[#allocation2 + $0xd0] sm:$0xff] %vm18_vm0, %v773_v2  ;;  %46 = vst.msk [vmem:[#allocation2 + $0xd8] sm:$0xff] %vm18_vm0, %v773_v2  ;;  %704 = vmatprep.subr.mxu0 %v116_v7  ;;  %762 = vmatprep.subr.mxu1 %v116_v7  ;;  %v107_v26 = vld [vmem:[%s1176_s0 + $0xc0] sm:$0xff]  ;;  %v108_v28 = vld [vmem:[%s1176_s0 + $0xc8] sm:$0xff] }
   0xf   :  { %47 = vst.msk [vmem:[#allocation2 + $0xe0] sm:$0xff] %vm18_vm0, %v773_v2  ;;  %48 = vst.msk [vmem:[#allocation2 + $0xe8] sm:$0xff] %vm18_vm0, %v773_v2  ;;  %705 = vmatpush3.msra.mxu0 %v116_v7  ;;  %770 = vmatpush3.msra.mxu1 %v116_v7  ;;  %v93_v29 = vld [vmem:[%s1176_s0 + $0x50] sm:$0xff]  ;;  %v94_v31 = vld [vmem:[%s1176_s0 + $0x58] sm:$0xff] }
  0x10   :  { %49 = vst.msk [vmem:[#allocation2 + $0xf0] sm:$0xff] %vm18_vm0, %v773_v2  ;;  %50 = vst.msk [vmem:[#allocation2 + $0xf8] sm:$0xff] %vm18_vm0, %v773_v2  ;;  %706 = vmatprep.subr.mxu0 %v115_v8  ;;  %763 = vmatprep.subr.mxu1 %v115_v8  ;;  %v109_v30 = vld [vmem:[%s1176_s0 + $0xd0] sm:$0xff]  ;;  %v110_v32 = vld [vmem:[%s1176_s0 + $0xd8] sm:$0xff] }
  0x11   :  { %707 = vmatpush3.msra.mxu0 %v115_v8  ;;  %771 = vmatpush3.msra.mxu1 %v115_v8  ;;  %v95_v33 = vld [vmem:[%s1176_s0 + $0x60] sm:$0xff]  ;;  %v96_v35 = vld [vmem:[%s1176_s0 + $0x68] sm:$0xff]  ;;  %v97_v37 = vld [vmem:[%s1176_s0 + $0x70] sm:$0xff] }
  0x12   :  { %708 = vmatprep.mubr.msk.f32.mxu0 %vm18_vm0, %v83_v9  ;;  %732 = vmatprep.mubr.msk.f32.mxu1 %vm18_vm0, %v99_v10  ;;  %v111_v34 = vld [vmem:[%s1176_s0 + $0xe0] sm:$0xff]  ;;  %v112_v36 = vld [vmem:[%s1176_s0 + $0xe8] sm:$0xff]  ;;  %v113_v38 = vld [vmem:[%s1176_s0 + $0xf0] sm:$0xff] }
  0x13   :  { %709 = vmatmul.mubr.msk.f32.vlgmr.msra.gmra.mxu0 %vm18_vm0, %v84_v11  ;;  %733 = vmatmul.mubr.msk.f32.vlgmr.msra.gmra.mxu1 %vm18_vm0, %v100_v12  ;;  %v98_v39 = vld [vmem:[%s1176_s0 + $0x78] sm:$0xff]  ;;  %v52_v41 = vld [vmem:[#allocation2 + $0x8] sm:$0xff]  ;;  %v51_v45 = vld [vmem:[#allocation2] sm:$0xff] }
  0x14   :  { %711 = vmatprep.mubr.msk.f32.mxu0 %vm18_vm0, %v85_v13  ;;  %735 = vmatprep.mubr.msk.f32.mxu1 %vm18_vm0, %v101_v14  ;;  %v114_v40 = vld [vmem:[%s1176_s0 + $0xf8] sm:$0xff]  ;;  %v68_v42 = vld [vmem:[#allocation2 + $0x88] sm:$0xff]  ;;  %v67_v46 = vld [vmem:[#allocation2 + $0x80] sm:$0xff] }
  0x15   :  { %v54_v51 = vld [vmem:[#allocation2 + $0x18] sm:$0xff]  ;;  %v53_v57 = vld [vmem:[#allocation2 + $0x10] sm:$0xff]  ;;  %v56_v63 = vld [vmem:[#allocation2 + $0x28] sm:$0xff] }
  0x16   :  { %v70_v52 = vld [vmem:[#allocation2 + $0x98] sm:$0xff]  ;;  %v69_v58 = vld [vmem:[#allocation2 + $0x90] sm:$0xff]  ;;  %v72_v0 = vld [vmem:[#allocation2 + $0xa8] sm:$0xff] }
  0x17   :  { %712 = vmatmul.mubr.msk.f32.gmra.mxu0 %vm18_vm0, %v86_v15  ;;  %736 = vmatmul.mubr.msk.f32.gmra.mxu1 %vm18_vm0, %v102_v16  ;;  %v987_v3 = vld [vmem:[%s1177_s2] ss:$0 sm:$0xff]  ;;  %v58_v10 = vld [vmem:[#allocation2 + $0x38] sm:$0xff] }
  0x18   :  { %714 = vmatprep.mubr.msk.f32.mxu0 %vm18_vm0, %v87_v17  ;;  %738 = vmatprep.mubr.msk.f32.mxu1 %vm18_vm0, %v103_v18  ;;  %v55_v6 = vld [vmem:[#allocation2 + $0x20] sm:$0xff]  ;;  %v74_v15 = vld [vmem:[#allocation2 + $0xb8] sm:$0xff] }
  0x19   :  { %v71_v7 = vld [vmem:[#allocation2 + $0xa0] sm:$0xff] }
  0x1b   :  { %715 = vmatmul.mubr.msk.f32.gmra.mxu0 %vm18_vm0, %v88_v19  ;;  %739 = vmatmul.mubr.msk.f32.gmra.mxu1 %vm18_vm0, %v104_v20  ;;  %v57_v20 = vld [vmem:[#allocation2 + $0x30] sm:$0xff] }
  0x1c   :  { %717 = vmatprep.mubr.msk.f32.mxu0 %vm18_vm0, %v89_v21  ;;  %741 = vmatprep.mubr.msk.f32.mxu1 %vm18_vm0, %v105_v22 }
  0x1f   :  { %718 = vmatmul.mubr.msk.f32.gmra.mxu0 %vm18_vm0, %v90_v23  ;;  %742 = vmatmul.mubr.msk.f32.gmra.mxu1 %vm18_vm0, %v106_v24 }
  0x20   :  { %720 = vmatprep.mubr.msk.f32.mxu0 %vm18_vm0, %v91_v25  ;;  %744 = vmatprep.mubr.msk.f32.mxu1 %vm18_vm0, %v107_v26  ;;  %v73_v25 = vld [vmem:[#allocation2 + $0xb0] sm:$0xff] }
  0x23   :  { %721 = vmatmul.mubr.msk.f32.gmra.mxu0 %vm18_vm0, %v92_v27  ;;  %745 = vmatmul.mubr.msk.f32.gmra.mxu1 %vm18_vm0, %v108_v28 }
  0x24   :  { %723 = vmatprep.mubr.msk.f32.mxu0 %vm18_vm0, %v93_v29  ;;  %747 = vmatprep.mubr.msk.f32.mxu1 %vm18_vm0, %v109_v30  ;;  %v60_v30 = vld [vmem:[#allocation2 + $0x48] sm:$0xff] }
  0x27   :  { %724 = vmatmul.mubr.msk.f32.gmra.mxu0 %vm18_vm0, %v94_v31  ;;  %748 = vmatmul.mubr.msk.f32.gmra.mxu1 %vm18_vm0, %v110_v32 }
  0x28   :  { %726 = vmatprep.mubr.msk.f32.mxu0 %vm18_vm0, %v95_v33  ;;  %750 = vmatprep.mubr.msk.f32.mxu1 %vm18_vm0, %v111_v34 }
  0x2b   :  { %727 = vmatmul.mubr.msk.f32.gmra.mxu0 %vm18_vm0, %v96_v35  ;;  %751 = vmatmul.mubr.msk.f32.gmra.mxu1 %vm18_vm0, %v112_v36  ;;  %v76_v35 = vld [vmem:[#allocation2 + $0xc8] sm:$0xff] }
  0x2c   :  { %729 = vmatprep.mubr.msk.f32.mxu0 %vm18_vm0, %v97_v37  ;;  %753 = vmatprep.mubr.msk.f32.mxu1 %vm18_vm0, %v113_v38 }
  0x2f   :  { %730 = vmatmul.mubr.msk.f32.gmra.mxu0 %vm18_vm0, %v98_v39  ;;  %754 = vmatmul.mubr.msk.f32.gmra.mxu1 %vm18_vm0, %v114_v40  ;;  %v59_v40 = vld [vmem:[#allocation2 + $0x40] sm:$0xff] }
  0xd3   :  { %v710_v43 = vpop.f32.mrf.mxu0  ;;  %v734_v44 = vpop.f32.mrf.mxu1 }
  0xd4   :  { %v446_v47 = vadd.f32 %v710_v43, %v52_v41  ;;  %v462_v48 = vadd.f32 %v734_v44, %v68_v42 }
  0xd5   :  { %v286_v49 = vpop.f32.mrf.mxu0  ;;  %v366_v50 = vpop.f32.mrf.mxu1 }
  0xd6   :  { %478 = vst.msk [vmem:[#allocation2 + $0x8] sm:$0xff] %vm18_vm0, %v446_v47  ;;  %494 = vst.msk [vmem:[#allocation2 + $0x88] sm:$0xff] %vm18_vm0, %v462_v48  ;;  %v445_v53 = vadd.f32 %v286_v49, %v51_v45  ;;  %v461_v54 = vadd.f32 %v366_v50, %v67_v46  ;;  %v75_v45 = vld [vmem:[#allocation2 + $0xc0] sm:$0xff]  ;;  %v62_v50 = vld [vmem:[#allocation2 + $0x58] sm:$0xff] }
  0xd7   :  { %v713_v55 = vpop.f32.mrf.mxu0  ;;  %v737_v56 = vpop.f32.mrf.mxu1 }
  0xd8   :  { %477 = vst.msk [vmem:[#allocation2] sm:$0xff] %vm18_vm0, %v445_v53  ;;  %493 = vst.msk [vmem:[#allocation2 + $0x80] sm:$0xff] %vm18_vm0, %v461_v54  ;;  %v448_v59 = vadd.f32 %v713_v55, %v54_v51  ;;  %v464_v60 = vadd.f32 %v737_v56, %v70_v52  ;;  %v78_v55 = vld [vmem:[#allocation2 + $0xd8] sm:$0xff] }
  0xd9   :  { %v296_v61 = vpop.f32.mrf.mxu0  ;;  %v376_v62 = vpop.f32.mrf.mxu1 }
  0xda   :  { %480 = vst.msk [vmem:[#allocation2 + $0x18] sm:$0xff] %vm18_vm0, %v448_v59  ;;  %496 = vst.msk [vmem:[#allocation2 + $0x98] sm:$0xff] %vm18_vm0, %v464_v60  ;;  %v447_v1 = vadd.f32 %v296_v61, %v53_v57  ;;  %v463_v2 = vadd.f32 %v376_v62, %v69_v58  ;;  %v61_v60 = vld [vmem:[#allocation2 + $0x50] sm:$0xff] }
  0xdb   :  { %v716_v4 = vpop.f32.mrf.mxu0  ;;  %v740_v5 = vpop.f32.mrf.mxu1 }
  0xdc   :  { %479 = vst.msk [vmem:[#allocation2 + $0x10] sm:$0xff] %vm18_vm0, %v447_v1  ;;  %495 = vst.msk [vmem:[#allocation2 + $0x90] sm:$0xff] %vm18_vm0, %v463_v2  ;;  %v450_v8 = vadd.f32 %v716_v4, %v56_v63  ;;  %v466_v9 = vadd.f32 %v740_v5, %v72_v0  ;;  %v77_v1 = vld [vmem:[#allocation2 + $0xd0] sm:$0xff] }
  0xdd   :  { %v513_v11 = vld [vmem:[#allocation2 + $0x8] sm:$0xff]  ;;  %v306_v13 = vpop.f32.mrf.mxu0  ;;  %v386_v14 = vpop.f32.mrf.mxu1 }
  0xde   :  { %v529_v12 = vld [vmem:[#allocation2 + $0x88] sm:$0xff]  ;;  %v552_v16 = vadd.f32 %v987_v3, %v513_v11  ;;  %482 = vst.msk [vmem:[#allocation2 + $0x28] sm:$0xff] %vm18_vm0, %v450_v8  ;;  %498 = vst.msk [vmem:[#allocation2 + $0xa8] sm:$0xff] %vm18_vm0, %v466_v9  ;;  %v449_v18 = vadd.f32 %v306_v13, %v55_v6  ;;  %v465_v19 = vadd.f32 %v386_v14, %v71_v7 }
  0xdf   :  { %v568_v17 = vadd.f32 %v987_v3, %v529_v12  ;;  %v512_v21 = vld [vmem:[#allocation2] sm:$0xff]  ;;  %v719_v23 = vpop.f32.mrf.mxu0  ;;  %v743_v24 = vpop.f32.mrf.mxu1  ;;  %v64_v7 = vld [vmem:[#allocation2 + $0x68] sm:$0xff] }
  0xe0   :  { %v528_v22 = vld [vmem:[#allocation2 + $0x80] sm:$0xff]  ;;  %584 = vst.msk [vmem:[%s1178_s3 + $0x8] sm:$0xff] %vm18_vm0, %v552_v16  ;;  %v551_v26 = vadd.f32 %v987_v3, %v512_v21  ;;  %481 = vst.msk [vmem:[#allocation2 + $0x20] sm:$0xff] %vm18_vm0, %v449_v18  ;;  %v452_v28 = vadd.f32 %v719_v23, %v58_v10  ;;  %v468_v29 = vadd.f32 %v743_v24, %v74_v15  ;;  %v80_v12 = vld [vmem:[#allocation2 + $0xe8] sm:$0xff] }
  0xe1   :  { %600 = vst.msk [vmem:[%s1178_s3 + $0x88] sm:$0xff] %vm18_vm0, %v568_v17  ;;  %v567_v27 = vadd.f32 %v987_v3, %v528_v22  ;;  %497 = vst.msk [vmem:[#allocation2 + $0xa0] sm:$0xff] %vm18_vm0, %v465_v19  ;;  %v515_v31 = vld [vmem:[#allocation2 + $0x18] sm:$0xff]  ;;  %v316_v33 = vpop.f32.mrf.mxu0  ;;  %v396_v34 = vpop.f32.mrf.mxu1  ;;  %v63_v17 = vld [vmem:[#allocation2 + $0x60] sm:$0xff] }
  0xe2   :  { %v531_v32 = vld [vmem:[#allocation2 + $0x98] sm:$0xff]  ;;  %583 = vst.msk [vmem:[%s1178_s3] sm:$0xff] %vm18_vm0, %v551_v26  ;;  %v554_v36 = vadd.f32 %v987_v3, %v515_v31  ;;  %484 = vst.msk [vmem:[#allocation2 + $0x38] sm:$0xff] %vm18_vm0, %v452_v28  ;;  %v451_v38 = vadd.f32 %v316_v33, %v57_v20  ;;  %v467_v39 = vadd.f32 %v396_v34, %v73_v25  ;;  %v79_v22 = vld [vmem:[#allocation2 + $0xe0] sm:$0xff] }
  0xe3   :  { %599 = vst.msk [vmem:[%s1178_s3 + $0x80] sm:$0xff] %vm18_vm0, %v567_v27  ;;  %v570_v37 = vadd.f32 %v987_v3, %v531_v32  ;;  %500 = vst.msk [vmem:[#allocation2 + $0xb8] sm:$0xff] %vm18_vm0, %v468_v29  ;;  %v514_v41 = vld [vmem:[#allocation2 + $0x10] sm:$0xff]  ;;  %v722_v43 = vpop.f32.mrf.mxu0  ;;  %v746_v44 = vpop.f32.mrf.mxu1  ;;  %v66_v27 = vld [vmem:[#allocation2 + $0x78] sm:$0xff] }
  0xe4   :  { %v530_v42 = vld [vmem:[#allocation2 + $0x90] sm:$0xff]  ;;  %586 = vst.msk [vmem:[%s1178_s3 + $0x18] sm:$0xff] %vm18_vm0, %v554_v36  ;;  %v553_v46 = vadd.f32 %v987_v3, %v514_v41  ;;  %483 = vst.msk [vmem:[#allocation2 + $0x30] sm:$0xff] %vm18_vm0, %v451_v38  ;;  %v454_v48 = vadd.f32 %v722_v43, %v60_v30  ;;  %v470_v49 = vadd.f32 %v746_v44, %v76_v35  ;;  %v82_v32 = vld [vmem:[#allocation2 + $0xf8] sm:$0xff] }
  0xe5   :  { %602 = vst.msk [vmem:[%s1178_s3 + $0x98] sm:$0xff] %vm18_vm0, %v570_v37  ;;  %v569_v47 = vadd.f32 %v987_v3, %v530_v42  ;;  %499 = vst.msk [vmem:[#allocation2 + $0xb0] sm:$0xff] %vm18_vm0, %v467_v39  ;;  %v517_v51 = vld [vmem:[#allocation2 + $0x28] sm:$0xff]  ;;  %v326_v53 = vpop.f32.mrf.mxu0  ;;  %v406_v54 = vpop.f32.mrf.mxu1  ;;  %v65_v37 = vld [vmem:[#allocation2 + $0x70] sm:$0xff] }
  0xe6   :  { %v533_v52 = vld [vmem:[#allocation2 + $0xa8] sm:$0xff]  ;;  %585 = vst.msk [vmem:[%s1178_s3 + $0x10] sm:$0xff] %vm18_vm0, %v553_v46  ;;  %v556_v56 = vadd.f32 %v987_v3, %v517_v51  ;;  %486 = vst.msk [vmem:[#allocation2 + $0x48] sm:$0xff] %vm18_vm0, %v454_v48  ;;  %v453_v58 = vadd.f32 %v326_v53, %v59_v40  ;;  %v469_v59 = vadd.f32 %v406_v54, %v75_v45  ;;  %v81_v42 = vld [vmem:[#allocation2 + $0xf0] sm:$0xff] }
  0xe7   :  { %601 = vst.msk [vmem:[%s1178_s3 + $0x90] sm:$0xff] %vm18_vm0, %v569_v47  ;;  %v572_v57 = vadd.f32 %v987_v3, %v533_v52  ;;  %502 = vst.msk [vmem:[#allocation2 + $0xc8] sm:$0xff] %vm18_vm0, %v470_v49  ;;  %v516_v61 = vld [vmem:[#allocation2 + $0x20] sm:$0xff]  ;;  %v725_v63 = vpop.f32.mrf.mxu0  ;;  %v749_v0 = vpop.f32.mrf.mxu1 }
  0xe8   :  { %v532_v62 = vld [vmem:[#allocation2 + $0xa0] sm:$0xff]  ;;  %588 = vst.msk [vmem:[%s1178_s3 + $0x28] sm:$0xff] %vm18_vm0, %v556_v56  ;;  %v555_v2 = vadd.f32 %v987_v3, %v516_v61  ;;  %485 = vst.msk [vmem:[#allocation2 + $0x40] sm:$0xff] %vm18_vm0, %v453_v58  ;;  %v456_v5 = vadd.f32 %v725_v63, %v62_v50  ;;  %v472_v6 = vadd.f32 %v749_v0, %v78_v55 }
  0xe9   :  { %604 = vst.msk [vmem:[%s1178_s3 + $0xa8] sm:$0xff] %vm18_vm0, %v572_v57  ;;  %v571_v4 = vadd.f32 %v987_v3, %v532_v62  ;;  %501 = vst.msk [vmem:[#allocation2 + $0xc0] sm:$0xff] %vm18_vm0, %v469_v59  ;;  %v519_v8 = vld [vmem:[#allocation2 + $0x38] sm:$0xff]  ;;  %v336_v10 = vpop.f32.mrf.mxu0  ;;  %v416_v11 = vpop.f32.mrf.mxu1 }
  0xea   :  { %v535_v9 = vld [vmem:[#allocation2 + $0xb8] sm:$0xff]  ;;  %587 = vst.msk [vmem:[%s1178_s3 + $0x20] sm:$0xff] %vm18_vm0, %v555_v2  ;;  %v558_v13 = vadd.f32 %v987_v3, %v519_v8  ;;  %488 = vst.msk [vmem:[#allocation2 + $0x58] sm:$0xff] %vm18_vm0, %v456_v5  ;;  %v455_v15 = vadd.f32 %v336_v10, %v61_v60  ;;  %v471_v16 = vadd.f32 %v416_v11, %v77_v1 }
  0xeb   :  { %603 = vst.msk [vmem:[%s1178_s3 + $0xa0] sm:$0xff] %vm18_vm0, %v571_v4  ;;  %v574_v14 = vadd.f32 %v987_v3, %v535_v9  ;;  %504 = vst.msk [vmem:[#allocation2 + $0xd8] sm:$0xff] %vm18_vm0, %v472_v6  ;;  %v518_v18 = vld [vmem:[#allocation2 + $0x30] sm:$0xff]  ;;  %v728_v20 = vpop.f32.mrf.mxu0  ;;  %v752_v21 = vpop.f32.mrf.mxu1 }
  0xec   :  { %v534_v19 = vld [vmem:[#allocation2 + $0xb0] sm:$0xff]  ;;  %590 = vst.msk [vmem:[%s1178_s3 + $0x38] sm:$0xff] %vm18_vm0, %v558_v13  ;;  %v557_v23 = vadd.f32 %v987_v3, %v518_v18  ;;  %487 = vst.msk [vmem:[#allocation2 + $0x50] sm:$0xff] %vm18_vm0, %v455_v15  ;;  %v458_v25 = vadd.f32 %v728_v20, %v64_v7  ;;  %v474_v26 = vadd.f32 %v752_v21, %v80_v12 }
  0xed   :  { %606 = vst.msk [vmem:[%s1178_s3 + $0xb8] sm:$0xff] %vm18_vm0, %v574_v14  ;;  %v573_v24 = vadd.f32 %v987_v3, %v534_v19  ;;  %503 = vst.msk [vmem:[#allocation2 + $0xd0] sm:$0xff] %vm18_vm0, %v471_v16  ;;  %v521_v28 = vld [vmem:[#allocation2 + $0x48] sm:$0xff]  ;;  %v346_v30 = vpop.f32.mrf.mxu0  ;;  %v426_v31 = vpop.f32.mrf.mxu1 }
  0xee   :  { %v537_v29 = vld [vmem:[#allocation2 + $0xc8] sm:$0xff]  ;;  %589 = vst.msk [vmem:[%s1178_s3 + $0x30] sm:$0xff] %vm18_vm0, %v557_v23  ;;  %v560_v33 = vadd.f32 %v987_v3, %v521_v28  ;;  %490 = vst.msk [vmem:[#allocation2 + $0x68] sm:$0xff] %vm18_vm0, %v458_v25  ;;  %v457_v35 = vadd.f32 %v346_v30, %v63_v17  ;;  %v473_v36 = vadd.f32 %v426_v31, %v79_v22 }
  0xef   :  { %605 = vst.msk [vmem:[%s1178_s3 + $0xb0] sm:$0xff] %vm18_vm0, %v573_v24  ;;  %v576_v34 = vadd.f32 %v987_v3, %v537_v29  ;;  %506 = vst.msk [vmem:[#allocation2 + $0xe8] sm:$0xff] %vm18_vm0, %v474_v26  ;;  %v520_v38 = vld [vmem:[#allocation2 + $0x40] sm:$0xff]  ;;  %v731_v40 = vpop.f32.mrf.mxu0  ;;  %v755_v41 = vpop.f32.mrf.mxu1 }
  0xf0   :  { %v536_v39 = vld [vmem:[#allocation2 + $0xc0] sm:$0xff]  ;;  %592 = vst.msk [vmem:[%s1178_s3 + $0x48] sm:$0xff] %vm18_vm0, %v560_v33  ;;  %v559_v43 = vadd.f32 %v987_v3, %v520_v38  ;;  %489 = vst.msk [vmem:[#allocation2 + $0x60] sm:$0xff] %vm18_vm0, %v457_v35  ;;  %v460_v45 = vadd.f32 %v731_v40, %v66_v27  ;;  %v476_v46 = vadd.f32 %v755_v41, %v82_v32 }
  0xf1   :  { %608 = vst.msk [vmem:[%s1178_s3 + $0xc8] sm:$0xff] %vm18_vm0, %v576_v34  ;;  %v575_v44 = vadd.f32 %v987_v3, %v536_v39  ;;  %505 = vst.msk [vmem:[#allocation2 + $0xe0] sm:$0xff] %vm18_vm0, %v473_v36  ;;  %v523_v47 = vld [vmem:[#allocation2 + $0x58] sm:$0xff]  ;;  %v356_v49 = vpop.f32.mrf.mxu0  ;;  %v436_v50 = vpop.f32.mrf.mxu1 }
  0xf2   :  { %v539_v48 = vld [vmem:[#allocation2 + $0xd8] sm:$0xff]  ;;  %591 = vst.msk [vmem:[%s1178_s3 + $0x40] sm:$0xff] %vm18_vm0, %v559_v43  ;;  %v562_v51 = vadd.f32 %v987_v3, %v523_v47  ;;  %492 = vst.msk [vmem:[#allocation2 + $0x78] sm:$0xff] %vm18_vm0, %v460_v45  ;;  %v459_v53 = vadd.f32 %v356_v49, %v65_v37  ;;  %v475_v54 = vadd.f32 %v436_v50, %v81_v42 }
  0xf3   :  { %607 = vst.msk [vmem:[%s1178_s3 + $0xc0] sm:$0xff] %vm18_vm0, %v575_v44  ;;  %v578_v52 = vadd.f32 %v987_v3, %v539_v48  ;;  %508 = vst.msk [vmem:[#allocation2 + $0xf8] sm:$0xff] %vm18_vm0, %v476_v46  ;;  %v522_v55 = vld [vmem:[#allocation2 + $0x50] sm:$0xff] }
  0xf4   :  { %v538_v56 = vld [vmem:[#allocation2 + $0xd0] sm:$0xff]  ;;  %594 = vst.msk [vmem:[%s1178_s3 + $0x58] sm:$0xff] %vm18_vm0, %v562_v51  ;;  %v561_v57 = vadd.f32 %v987_v3, %v522_v55  ;;  %491 = vst.msk [vmem:[#allocation2 + $0x70] sm:$0xff] %vm18_vm0, %v459_v53 }
  0xf5   :  { %610 = vst.msk [vmem:[%s1178_s3 + $0xd8] sm:$0xff] %vm18_vm0, %v578_v52  ;;  %v577_v58 = vadd.f32 %v987_v3, %v538_v56  ;;  %507 = vst.msk [vmem:[#allocation2 + $0xf0] sm:$0xff] %vm18_vm0, %v475_v54  ;;  %v525_v59 = vld [vmem:[#allocation2 + $0x68] sm:$0xff] }
  0xf6   :  { %v541_v60 = vld [vmem:[#allocation2 + $0xe8] sm:$0xff]  ;;  %593 = vst.msk [vmem:[%s1178_s3 + $0x50] sm:$0xff] %vm18_vm0, %v561_v57  ;;  %v564_v61 = vadd.f32 %v987_v3, %v525_v59 }
  0xf7   :  { %609 = vst.msk [vmem:[%s1178_s3 + $0xd0] sm:$0xff] %vm18_vm0, %v577_v58  ;;  %v580_v62 = vadd.f32 %v987_v3, %v541_v60  ;;  %v524_v63 = vld [vmem:[#allocation2 + $0x60] sm:$0xff] }
  0xf8   :  { %v540_v0 = vld [vmem:[#allocation2 + $0xe0] sm:$0xff]  ;;  %596 = vst.msk [vmem:[%s1178_s3 + $0x68] sm:$0xff] %vm18_vm0, %v564_v61  ;;  %v563_v1 = vadd.f32 %v987_v3, %v524_v63 }
  0xf9   :  { %612 = vst.msk [vmem:[%s1178_s3 + $0xe8] sm:$0xff] %vm18_vm0, %v580_v62  ;;  %v579_v2 = vadd.f32 %v987_v3, %v540_v0  ;;  %v527_v4 = vld [vmem:[#allocation2 + $0x78] sm:$0xff] }
  0xfa   :  { %v543_v5 = vld [vmem:[#allocation2 + $0xf8] sm:$0xff]  ;;  %595 = vst.msk [vmem:[%s1178_s3 + $0x60] sm:$0xff] %vm18_vm0, %v563_v1  ;;  %v566_v6 = vadd.f32 %v987_v3, %v527_v4 }
  0xfb   :  { %611 = vst.msk [vmem:[%s1178_s3 + $0xe0] sm:$0xff] %vm18_vm0, %v579_v2  ;;  %v582_v7 = vadd.f32 %v987_v3, %v543_v5  ;;  %v526_v8 = vld [vmem:[#allocation2 + $0x70] sm:$0xff] }
  0xfc   :  { %v542_v9 = vld [vmem:[#allocation2 + $0xf0] sm:$0xff]  ;;  %598 = vst.msk [vmem:[%s1178_s3 + $0x78] sm:$0xff] %vm18_vm0, %v566_v6  ;;  %v565_v10 = vadd.f32 %v987_v3, %v526_v8 }
  0xfd   :  { %614 = vst.msk [vmem:[%s1178_s3 + $0xf8] sm:$0xff] %vm18_vm0, %v582_v7  ;;  %v581_v11 = vadd.f32 %v987_v3, %v542_v9 }
  0xfe   :  { %597 = vst.msk [vmem:[%s1178_s3 + $0x70] sm:$0xff] %vm18_vm0, %v565_v10 }
  0xff   :  { %613 = vst.msk [vmem:[%s1178_s3 + $0xf0] sm:$0xff] %vm18_vm0, %v581_v11 }

// kernel: mlrf_forward.2
= control target key start
LH: loop header
LB: loop body
LE: loop exit
PB: predicated region body
PF: predicated region fallthrough
CT: control target
= control target key end

     0   :  { %vm27_vm0 = vcmask 261120   ;;  %vm644_vm1 = vcmask 1043456   ;;  %vm547_vm2 = vcmask 31744   ;;  %s2593_s1 = inlined_call_operand.vmem [shape: f32[32,4], index: 1, kind: input, shape index: {}]   ;;  %s2594_s0 = inlined_call_operand.vmem [shape: f32[256,32], index: 0, kind: input, shape index: {}]   ;;  %s2595_s2 = inlined_call_operand.vmem [shape: f32[4,32], index: 2, kind: input, shape index: {}]   ;;  %s2596_s4 = inlined_call_operand.vmem [shape: f32[32,32], index: 4, kind: input, shape index: {}]   ;;  %s2597_s3 = inlined_call_operand.vmem [shape: f32[1,32], index: 3, kind: input, shape index: {}]   ;;  %s2598_s5 = inlined_call_operand.vmem [shape: f32[1,32], index: 5, kind: input, shape index: {}]   ;;  %s2599_s6 = inlined_call_operand.vmem [shape: f32[256,32], index: 6, kind: output, shape index: {}]  }
   0x1   :  { %v127_v0 = vld [vmem:[%s2593_s1 + $0x18] sm:$0xff]  ;;  %v126_v1 = vld [vmem:[%s2593_s1 + $0x10] sm:$0xff]  ;;  %v1953_v2 = vld [vmem:[%s2594_s0] sm:$0xff] }
   0x2   :  { %1679 = vmatprep.subr.mxu0 %v127_v0  ;;  %v125_v3 = vld [vmem:[%s2593_s1 + $0x8] sm:$0xff]  ;;  %v92_v4 = vmul.f32 %v1953_v2, %v1953_v2  ;;  %v1968_v6 = vld [vmem:[%s2594_s0 + $0x10] sm:$0xff]  ;;  %v124_v7 = vld [vmem:[%s2593_s1] sm:$0xff] }
   0x3   :  { %1680 = vmatpush3.msra.mxu0 %v127_v0  ;;  %v1963_v5 = vld [vmem:[%s2594_s0 + $0x8] sm:$0xff]  ;;  %v94_v9 = vmul.f32 %v1968_v6, %v1968_v6  ;;  %v1981_v10 = vld [vmem:[%s2594_s0 + $0x18] sm:$0xff]  ;;  %v1986_v11 = vld [vmem:[%s2594_s0 + $0x20] sm:$0xff] }
   0x4   :  { %1681 = vmatprep.subr.mxu0 %v126_v1  ;;  %1687 = vmatprep.mubr.msk.f32.mxu0 %vm27_vm0, %v92_v4  ;;  %v93_v8 = vmul.f32 %v1963_v5, %v1963_v5  ;;  %v95_v12 = vmul.f32 %v1981_v10, %v1981_v10  ;;  %v96_v13 = vmul.f32 %v1986_v11, %v1986_v11  ;;  %v1997_v14 = vld [vmem:[%s2594_s0 + $0x28] sm:$0xff]  ;;  %v2002_v15 = vld [vmem:[%s2594_s0 + $0x30] sm:$0xff]  ;;  %v546_v16 = vld [vmem:[%s2595_s2] sm:$0xf] }
   0x5   :  { %1682 = vmatpush3.msra.mxu0 %v126_v1  ;;  %v97_v17 = vmul.f32 %v1997_v14, %v1997_v14  ;;  %v98_v18 = vmul.f32 %v2002_v15, %v2002_v15  ;;  %v2016_v19 = vld [vmem:[%s2594_s0 + $0x38] sm:$0xff]  ;;  %v2021_v20 = vld [vmem:[%s2594_s0 + $0x40] sm:$0xff]  ;;  %1841 = vmatprep.subr.msk.mxu1 %vm644_vm1, %v546_v16  ;;  %v2032_v23 = vld [vmem:[%s2594_s0 + $0x48] sm:$0xff] }
   0x6   :  { %1683 = vmatprep.subr.mxu0 %v125_v3  ;;  %1842 = vmatpush3.msk.msra.mxu1 %vm644_vm1, %v546_v16  ;;  %v99_v21 = vmul.f32 %v2016_v19, %v2016_v19  ;;  %v100_v22 = vmul.f32 %v2021_v20, %v2021_v20  ;;  %v2037_v24 = vld [vmem:[%s2594_s0 + $0x50] sm:$0xff]  ;;  %v101_v25 = vmul.f32 %v2032_v23, %v2032_v23  ;;  %v2048_v27 = vld [vmem:[%s2594_s0 + $0x58] sm:$0xff]  ;;  %v2053_v28 = vld [vmem:[%s2594_s0 + $0x60] sm:$0xff] }
   0x7   :  { %1684 = vmatpush3.msra.mxu0 %v125_v3  ;;  %v102_v26 = vmul.f32 %v2037_v24, %v2037_v24  ;;  %v103_v29 = vmul.f32 %v2048_v27, %v2048_v27  ;;  %v104_v30 = vmul.f32 %v2053_v28, %v2053_v28  ;;  %v2064_v31 = vld [vmem:[%s2594_s0 + $0x68] sm:$0xff]  ;;  %v2069_v32 = vld [vmem:[%s2594_s0 + $0x70] sm:$0xff]  ;;  %v2080_v35 = vld [vmem:[%s2594_s0 + $0x78] sm:$0xff] }
   0x8   :  { %1685 = vmatprep.subr.mxu0 %v124_v7  ;;  %v105_v33 = vmul.f32 %v2064_v31, %v2064_v31  ;;  %v106_v34 = vmul.f32 %v2069_v32, %v2069_v32  ;;  %v2085_v36 = vld [vmem:[%s2594_s0 + $0x80] sm:$0xff]  ;;  %v107_v37 = vmul.f32 %v2080_v35, %v2080_v35  ;;  %v2096_v39 = vld [vmem:[%s2594_s0 + $0x88] sm:$0xff]  ;;  %v2101_v40 = vld [vmem:[%s2594_s0 + $0x90] sm:$0xff] }
   0x9   :  { %1686 = vmatpush3.msra.mxu0 %v124_v7  ;;  %v108_v38 = vmul.f32 %v2085_v36, %v2085_v36  ;;  %v109_v41 = vmul.f32 %v2096_v39, %v2096_v39  ;;  %v110_v42 = vmul.f32 %v2101_v40, %v2101_v40  ;;  %v2112_v43 = vld [vmem:[%s2594_s0 + $0x98] sm:$0xff]  ;;  %v2117_v44 = vld [vmem:[%s2594_s0 + $0xa0] sm:$0xff]  ;;  %v2128_v47 = vld [vmem:[%s2594_s0 + $0xa8] sm:$0xff] }
   0xa   :  { %1688 = vmatmul.mubr.msk.f32.vlgmr.msra.gmra.mxu0 %vm27_vm0, %v93_v8  ;;  %1735 = vmatprep.subr.msk.mxu0 %vm644_vm1, %v546_v16  ;;  %v111_v45 = vmul.f32 %v2112_v43, %v2112_v43  ;;  %v112_v46 = vmul.f32 %v2117_v44, %v2117_v44  ;;  %v2133_v48 = vld [vmem:[%s2594_s0 + $0xb0] sm:$0xff]  ;;  %v113_v49 = vmul.f32 %v2128_v47, %v2128_v47  ;;  %v2144_v51 = vld [vmem:[%s2594_s0 + $0xb8] sm:$0xff]  ;;  %v2149_v52 = vld [vmem:[%s2594_s0 + $0xc0] sm:$0xff] }
   0xb   :  { %1690 = vmatprep.mubr.msk.f32.mxu0 %vm27_vm0, %v94_v9  ;;  %1736 = vmatpush3.msk.msra.mxu0 %vm644_vm1, %v546_v16  ;;  %v114_v50 = vmul.f32 %v2133_v48, %v2133_v48  ;;  %v115_v53 = vmul.f32 %v2144_v51, %v2144_v51  ;;  %v116_v54 = vmul.f32 %v2149_v52, %v2149_v52  ;;  %v2160_v55 = vld [vmem:[%s2594_s0 + $0xc8] sm:$0xff]  ;;  %v2165_v56 = vld [vmem:[%s2594_s0 + $0xd0] sm:$0xff]  ;;  %v2176_v59 = vld [vmem:[%s2594_s0 + $0xd8] sm:$0xff] }
   0xc   :  { %v117_v57 = vmul.f32 %v2160_v55, %v2160_v55  ;;  %v118_v58 = vmul.f32 %v2165_v56, %v2165_v56  ;;  %v2181_v60 = vld [vmem:[%s2594_s0 + $0xe0] sm:$0xff]  ;;  %v119_v61 = vmul.f32 %v2176_v59, %v2176_v59  ;;  %v2192_v63 = vld [vmem:[%s2594_s0 + $0xe8] sm:$0xff]  ;;  %v2197_v0 = vld [vmem:[%s2594_s0 + $0xf0] sm:$0xff] }
   0xd   :  { %v120_v62 = vmul.f32 %v2181_v60, %v2181_v60  ;;  %v121_v1 = vmul.f32 %v2192_v63, %v2192_v63  ;;  %v122_v3 = vmul.f32 %v2197_v0, %v2197_v0  ;;  %v2208_v4 = vld [vmem:[%s2594_s0 + $0xf8] sm:$0xff] }
   0xe   :  { %1691 = vmatmul.mubr.msk.f32.gmra.mxu0 %vm27_vm0, %v95_v12  ;;  %v123_v7 = vmul.f32 %v2208_v4, %v2208_v4  ;;  %v2218_v8 = vld [vmem:[%s2596_s4 + $0x18] sm:$0xff] }
   0xf   :  { %1693 = vmatprep.mubr.msk.f32.mxu0 %vm27_vm0, %v96_v13  ;;  %1785 = vmatprep.subr.mxu1 %v2218_v8 }
  0x12   :  { %1694 = vmatmul.mubr.msk.f32.gmra.mxu0 %vm27_vm0, %v97_v17 }
  0x13   :  { %1696 = vmatprep.mubr.msk.f32.mxu0 %vm27_vm0, %v98_v18 }
  0x16   :  { %1697 = vmatmul.mubr.msk.f32.gmra.mxu0 %vm27_vm0, %v99_v21 }
  0x17   :  { %1699 = vmatprep.mubr.msk.f32.mxu0 %vm27_vm0, %v100_v22 }
  0x1a   :  { %1700 = vmatmul.mubr.msk.f32.gmra.mxu0 %vm27_vm0, %v101_v25 }
  0x1b   :  { %1702 = vmatprep.mubr.msk.f32.mxu0 %vm27_vm0, %v102_v26 }
  0x1e   :  { %1703 = vmatmul.mubr.msk.f32.gmra.mxu0 %vm27_vm0, %v103_v29 }
  0x1f   :  { %1705 = vmatprep.mubr.msk.f32.mxu0 %vm27_vm0, %v104_v30 }
  0x22   :  { %1706 = vmatmul.mubr.msk.f32.gmra.mxu0 %vm27_vm0, %v105_v33 }
  0x23   :  { %1708 = vmatprep.mubr.msk.f32.mxu0 %vm27_vm0, %v106_v34 }
  0x26   :  { %1709 = vmatmul.mubr.msk.f32.gmra.mxu0 %vm27_vm0, %v107_v37 }
  0x27   :  { %1711 = vmatprep.mubr.msk.f32.mxu0 %vm27_vm0, %v108_v38 }
  0x2a   :  { %1712 = vmatmul.mubr.msk.f32.gmra.mxu0 %vm27_vm0, %v109_v41 }
  0x2b   :  { %1714 = vmatprep.mubr.msk.f32.mxu0 %vm27_vm0, %v110_v42 }
  0x2e   :  { %1715 = vmatmul.mubr.msk.f32.gmra.mxu0 %vm27_vm0, %v111_v45 }
  0x2f   :  { %1717 = vmatprep.mubr.msk.f32.mxu0 %vm27_vm0, %v112_v46 }
  0x32   :  { %1718 = vmatmul.mubr.msk.f32.gmra.mxu0 %vm27_vm0, %v113_v49 }
  0x33   :  { %1720 = vmatprep.mubr.msk.f32.mxu0 %vm27_vm0, %v114_v50 }
  0x36   :  { %1721 = vmatmul.mubr.msk.f32.gmra.mxu0 %vm27_vm0, %v115_v53 }
  0x37   :  { %1723 = vmatprep.mubr.msk.f32.mxu0 %vm27_vm0, %v116_v54 }
  0x3a   :  { %1724 = vmatmul.mubr.msk.f32.gmra.mxu0 %vm27_vm0, %v117_v57 }
  0x3b   :  { %1726 = vmatprep.mubr.msk.f32.mxu0 %vm27_vm0, %v118_v58 }
  0x3e   :  { %1727 = vmatmul.mubr.msk.f32.gmra.mxu0 %vm27_vm0, %v119_v61 }
  0x3f   :  { %1729 = vmatprep.mubr.msk.f32.mxu0 %vm27_vm0, %v120_v62 }
  0x42   :  { %1730 = vmatmul.mubr.msk.f32.gmra.mxu0 %vm27_vm0, %v121_v1 }
  0x43   :  { %1732 = vmatprep.mubr.msk.f32.mxu0 %vm27_vm0, %v122_v3 }
  0x46   :  { %1733 = vmatmul.mubr.msk.f32.gmra.mxu0 %vm27_vm0, %v123_v7 }
  0xca   :  { %v1689_v9 = vpop.f32.mrf.mxu0 }
  0xcb   :  { %v451_v12 = vmul.f32 0.125, %v1689_v9 }
  0xcc   :  { %v291_v13 = vpop.f32.mrf.mxu0 }
  0xcd   :  { %v450_v16 = vmul.f32 0.125, %v291_v13  ;;  %v483_v17 = vadd.f32 1e-05, %v451_v12 }
  0xce   :  { %v1692_v18 = vpop.f32.mrf.mxu0 }
  0xcf   :  { %v482_v21 = vadd.f32 1e-05, %v450_v16  ;;  %v453_v22 = vmul.f32 0.125, %v1692_v18 }
  0xd0   :  { %v301_v25 = vpop.f32.mrf.mxu0 }
  0xd1   :  { %1844 = vrsqrt.f32 %v482_v21  ;;  %v452_v26 = vmul.f32 0.125, %v301_v25  ;;  %v485_v29 = vadd.f32 1e-05, %v453_v22 }
  0xd2   :  { %1846 = vrsqrt.f32 %v483_v17  ;;  %v1695_v30 = vpop.f32.mrf.mxu0 }
  0xd3   :  { %v484_v33 = vadd.f32 1e-05, %v452_v26  ;;  %v455_v34 = vmul.f32 0.125, %v1695_v30 }
  0xd4   :  { %v311_v37 = vpop.f32.mrf.mxu0 }
  0xd5   :  { %1848 = vrsqrt.f32 %v484_v33  ;;  %v454_v38 = vmul.f32 0.125, %v311_v37  ;;  %v487_v41 = vadd.f32 1e-05, %v455_v34 }
  0xd6   :  { %1850 = vrsqrt.f32 %v485_v29  ;;  %v1698_v42 = vpop.f32.mrf.mxu0 }
  0xd7   :  { %v486_v45 = vadd.f32 1e-05, %v454_v38  ;;  %v457_v46 = vmul.f32 0.125, %v1698_v42 }
  0xd8   :  { %v321_v49 = vpop.f32.mrf.mxu0 }
  0xd9   :  { %1852 = vrsqrt.f32 %v486_v45  ;;  %v456_v50 = vmul.f32 0.125, %v321_v49  ;;  %v489_v53 = vadd.f32 1e-05, %v457_v46 }
  0xda   :  { %1854 = vrsqrt.f32 %v487_v41  ;;  %v1701_v54 = vpop.f32.mrf.mxu0 }
  0xdb   :  { %v488_v57 = vadd.f32 1e-05, %v456_v50  ;;  %v459_v58 = vmul.f32 0.125, %v1701_v54 }
  0xdc   :  { %v331_v61 = vpop.f32.mrf.mxu0 }
  0xdd   :  { %1856 = vrsqrt.f32 %v488_v57  ;;  %v458_v62 = vmul.f32 0.125, %v331_v61  ;;  %v491_v3 = vadd.f32 1e-05, %v459_v58 }
  0xde   :  { %v1845_v1 = vpop.eup %1844  ;;  %1858 = vrsqrt.f32 %v489_v53  ;;  %v1704_v7 = vpop.f32.mrf.mxu0 }
  0xdf   :  { %v1847_v9 = vpop.eup %1846  ;;  %v490_v12 = vadd.f32 1e-05, %v458_v62  ;;  %v461_v13 = vmul.f32 0.125, %v1704_v7  ;;  %1737 = vmatprep.mubr.msk.f32.mxu0 %vm547_vm2, %v1845_v1 }
  0xe0   :  { %v341_v16 = vpop.f32.mrf.mxu0  ;;  %1738 = vmatmul.mubr.msk.f32.vlgmr.msra.gmra.mxu0 %vm547_vm2, %v1847_v9 }
  0xe1   :  { %1860 = vrsqrt.f32 %v490_v12  ;;  %v460_v17 = vmul.f32 0.125, %v341_v16  ;;  %v493_v21 = vadd.f32 1e-05, %v461_v13 }
  0xe2   :  { %v1849_v18 = vpop.eup %1848  ;;  %1862 = vrsqrt.f32 %v491_v3  ;;  %v1707_v22 = vpop.f32.mrf.mxu0 }
  0xe3   :  { %v1851_v25 = vpop.eup %1850  ;;  %v492_v26 = vadd.f32 1e-05, %v460_v17  ;;  %v463_v29 = vmul.f32 0.125, %v1707_v22  ;;  %1740 = vmatprep.mubr.msk.f32.mxu0 %vm547_vm2, %v1849_v18 }
  0xe4   :  { %v351_v30 = vpop.f32.mrf.mxu0  ;;  %1741 = vmatmul.mubr.msk.f32.gmra.mxu0 %vm547_vm2, %v1851_v25 }
  0xe5   :  { %1864 = vrsqrt.f32 %v492_v26  ;;  %v462_v33 = vmul.f32 0.125, %v351_v30  ;;  %v495_v37 = vadd.f32 1e-05, %v463_v29 }
  0xe6   :  { %v1853_v34 = vpop.eup %1852  ;;  %1866 = vrsqrt.f32 %v493_v21  ;;  %v1710_v38 = vpop.f32.mrf.mxu0 }
  0xe7   :  { %v1855_v41 = vpop.eup %1854  ;;  %v494_v42 = vadd.f32 1e-05, %v462_v33  ;;  %v465_v45 = vmul.f32 0.125, %v1710_v38  ;;  %1743 = vmatprep.mubr.msk.f32.mxu0 %vm547_vm2, %v1853_v34 }
  0xe8   :  { %v361_v46 = vpop.f32.mrf.mxu0  ;;  %1744 = vmatmul.mubr.msk.f32.gmra.mxu0 %vm547_vm2, %v1855_v41 }
  0xe9   :  { %1868 = vrsqrt.f32 %v494_v42  ;;  %v464_v49 = vmul.f32 0.125, %v361_v46  ;;  %v497_v53 = vadd.f32 1e-05, %v465_v45 }
  0xea   :  { %v1857_v50 = vpop.eup %1856  ;;  %1870 = vrsqrt.f32 %v495_v37  ;;  %v1713_v54 = vpop.f32.mrf.mxu0 }
  0xeb   :  { %v1859_v57 = vpop.eup %1858  ;;  %v496_v58 = vadd.f32 1e-05, %v464_v49  ;;  %v467_v61 = vmul.f32 0.125, %v1713_v54  ;;  %1746 = vmatprep.mubr.msk.f32.mxu0 %vm547_vm2, %v1857_v50 }
  0xec   :  { %v371_v62 = vpop.f32.mrf.mxu0  ;;  %1747 = vmatmul.mubr.msk.f32.gmra.mxu0 %vm547_vm2, %v1859_v57 }
  0xed   :  { %1872 = vrsqrt.f32 %v496_v58  ;;  %v466_v1 = vmul.f32 0.125, %v371_v62  ;;  %v499_v7 = vadd.f32 1e-05, %v467_v61 }
  0xee   :  { %v1861_v3 = vpop.eup %1860  ;;  %1874 = vrsqrt.f32 %v497_v53  ;;  %v1716_v9 = vpop.f32.mrf.mxu0 }
  0xef   :  { %v1863_v12 = vpop.eup %1862  ;;  %v498_v13 = vadd.f32 1e-05, %v466_v1  ;;  %v469_v16 = vmul.f32 0.125, %v1716_v9  ;;  %1749 = vmatprep.mubr.msk.f32.mxu0 %vm547_vm2, %v1861_v3  ;;  %v978_v1 = vld [vmem:[%s2596_s4 + $0x10] sm:$0xff]  ;;  %v977_v9 = vld [vmem:[%s2596_s4 + $0x8] sm:$0xff] }
  0xf0   :  { %v381_v17 = vpop.f32.mrf.mxu0  ;;  %1750 = vmatmul.mubr.msk.f32.gmra.mxu0 %vm547_vm2, %v1863_v12 }
  0xf1   :  { %1876 = vrsqrt.f32 %v498_v13  ;;  %v468_v18 = vmul.f32 0.125, %v381_v17  ;;  %v501_v22 = vadd.f32 1e-05, %v469_v16 }
  0xf2   :  { %v1865_v21 = vpop.eup %1864  ;;  %1878 = vrsqrt.f32 %v499_v7  ;;  %v1719_v25 = vpop.f32.mrf.mxu0 }
  0xf3   :  { %v1867_v26 = vpop.eup %1866  ;;  %v500_v29 = vadd.f32 1e-05, %v468_v18  ;;  %v471_v30 = vmul.f32 0.125, %v1719_v25  ;;  %1752 = vmatprep.mubr.msk.f32.mxu0 %vm547_vm2, %v1865_v21 }
  0xf4   :  { %v391_v33 = vpop.f32.mrf.mxu0  ;;  %1753 = vmatmul.mubr.msk.f32.gmra.mxu0 %vm547_vm2, %v1867_v26 }
  0xf5   :  { %1880 = vrsqrt.f32 %v500_v29  ;;  %v470_v34 = vmul.f32 0.125, %v391_v33  ;;  %v503_v38 = vadd.f32 1e-05, %v471_v30 }
  0xf6   :  { %v1869_v37 = vpop.eup %1868  ;;  %1882 = vrsqrt.f32 %v501_v22  ;;  %v1722_v41 = vpop.f32.mrf.mxu0  ;;  %v976_v22 = vld [vmem:[%s2596_s4] sm:$0xff] }
  0xf7   :  { %v1871_v42 = vpop.eup %1870  ;;  %v502_v45 = vadd.f32 1e-05, %v470_v34  ;;  %v473_v46 = vmul.f32 0.125, %v1722_v41  ;;  %1755 = vmatprep.mubr.msk.f32.mxu0 %vm547_vm2, %v1869_v37 }
  0xf8   :  { %v401_v49 = vpop.f32.mrf.mxu0  ;;  %1756 = vmatmul.mubr.msk.f32.gmra.mxu0 %vm547_vm2, %v1871_v42 }
  0xf9   :  { %1884 = vrsqrt.f32 %v502_v45  ;;  %v472_v50 = vmul.f32 0.125, %v401_v49  ;;  %v505_v54 = vadd.f32 1e-05, %v473_v46 }
  0xfa   :  { %v1873_v53 = vpop.eup %1872  ;;  %1886 = vrsqrt.f32 %v503_v38  ;;  %v1725_v57 = vpop.f32.mrf.mxu0 }
  0xfb   :  { %v1875_v58 = vpop.eup %1874  ;;  %v504_v61 = vadd.f32 1e-05, %v472_v50  ;;  %v475_v62 = vmul.f32 0.125, %v1725_v57  ;;  %1758 = vmatprep.mubr.msk.f32.mxu1 %vm547_vm2, %v1873_v53 }
  0xfc   :  { %v411_v3 = vpop.f32.mrf.mxu0  ;;  %1759 = vmatmul.mubr.msk.f32.vlgmr.msra.gmra.mxu1 %vm547_vm2, %v1875_v58 }
  0xfd   :  { %1888 = vrsqrt.f32 %v504_v61  ;;  %v474_v7 = vmul.f32 0.125, %v411_v3  ;;  %1786 = vmatpush3.msra.mxu1 %v2218_v8  ;;  %v507_v13 = vadd.f32 1e-05, %v475_v62 }
  0xfe   :  { %v1877_v12 = vpop.eup %1876  ;;  %1890 = vrsqrt.f32 %v505_v54  ;;  %v1728_v16 = vpop.f32.mrf.mxu0  ;;  %1787 = vmatprep.subr.mxu1 %v978_v1 }
  0xff   :  { %v1879_v17 = vpop.eup %1878  ;;  %v506_v18 = vadd.f32 1e-05, %v474_v7  ;;  %v477_v21 = vmul.f32 0.125, %v1728_v16  ;;  %1761 = vmatprep.mubr.msk.f32.mxu1 %vm547_vm2, %v1877_v12  ;;  %1788 = vmatpush3.msra.mxu1 %v978_v1 }
 0x100   :  { %v421_v8 = vpop.f32.mrf.mxu0  ;;  %1762 = vmatmul.mubr.msk.f32.gmra.mxu1 %vm547_vm2, %v1879_v17  ;;  %1789 = vmatprep.subr.mxu1 %v977_v9 }
 0x101   :  { %1892 = vrsqrt.f32 %v506_v18  ;;  %v476_v25 = vmul.f32 0.125, %v421_v8  ;;  %1790 = vmatpush3.msra.mxu1 %v977_v9  ;;  %v509_v29 = vadd.f32 1e-05, %v477_v21  ;;  %v1908_v21 = vmov 0.0  }
 0x102   :  { %v1881_v26 = vpop.eup %1880  ;;  %1894 = vrsqrt.f32 %v507_v13  ;;  %v1731_v30 = vpop.f32.mrf.mxu0  ;;  %1791 = vmatprep.subr.mxu1 %v976_v22  ;;  %29 = vst.msk [vmem:[#allocation2 + $0x8] sm:$0xff] %vm27_vm0, %v1908_v21  ;;  %28 = vst.msk [vmem:[#allocation2] sm:$0xff] %vm27_vm0, %v1908_v21 }
 0x103   :  { %v1883_v33 = vpop.eup %1882  ;;  %v508_v34 = vadd.f32 1e-05, %v476_v25  ;;  %v479_v37 = vmul.f32 0.125, %v1731_v30  ;;  %1764 = vmatprep.mubr.msk.f32.mxu1 %vm547_vm2, %v1881_v26  ;;  %1792 = vmatpush3.msra.mxu1 %v976_v22  ;;  %30 = vst.msk [vmem:[#allocation2 + $0x10] sm:$0xff] %vm27_vm0, %v1908_v21  ;;  %31 = vst.msk [vmem:[#allocation2 + $0x18] sm:$0xff] %vm27_vm0, %v1908_v21 }
 0x104   :  { %v431_v38 = vpop.f32.mrf.mxu0  ;;  %1765 = vmatmul.mubr.msk.f32.gmra.mxu1 %vm547_vm2, %v1883_v33  ;;  %32 = vst.msk [vmem:[#allocation2 + $0x20] sm:$0xff] %vm27_vm0, %v1908_v21  ;;  %33 = vst.msk [vmem:[#allocation2 + $0x28] sm:$0xff] %vm27_vm0, %v1908_v21  ;;  %v2299_v26 = vld [vmem:[%s2597_s3] ss:$0 sm:$0xff] }
 0x105   :  { %1896 = vrsqrt.f32 %v508_v34  ;;  %v478_v41 = vmul.f32 0.125, %v431_v38  ;;  %v511_v45 = vadd.f32 1e-05, %v479_v37  ;;  %34 = vst.msk [vmem:[#allocation2 + $0x30] sm:$0xff] %vm27_vm0, %v1908_v21  ;;  %35 = vst.msk [vmem:[#allocation2 + $0x38] sm:$0xff] %vm27_vm0, %v1908_v21 }
 0x106   :  { %v1885_v42 = vpop.eup %1884  ;;  %1898 = vrsqrt.f32 %v509_v29  ;;  %v1734_v46 = vpop.f32.mrf.mxu0  ;;  %36 = vst.msk [vmem:[#allocation2 + $0x40] sm:$0xff] %vm27_vm0, %v1908_v21  ;;  %37 = vst.msk [vmem:[#allocation2 + $0x48] sm:$0xff] %vm27_vm0, %v1908_v21 }
 0x107   :  { %v1887_v49 = vpop.eup %1886  ;;  %v510_v50 = vadd.f32 1e-05, %v478_v41  ;;  %v481_v53 = vmul.f32 0.125, %v1734_v46  ;;  %1767 = vmatprep.mubr.msk.f32.mxu1 %vm547_vm2, %v1885_v42  ;;  %38 = vst.msk [vmem:[#allocation2 + $0x50] sm:$0xff] %vm27_vm0, %v1908_v21  ;;  %39 = vst.msk [vmem:[#allocation2 + $0x58] sm:$0xff] %vm27_vm0, %v1908_v21 }
 0x108   :  { %v441_v54 = vpop.f32.mrf.mxu0  ;;  %1768 = vmatmul.mubr.msk.f32.gmra.mxu1 %vm547_vm2, %v1887_v49  ;;  %40 = vst.msk [vmem:[#allocation2 + $0x60] sm:$0xff] %vm27_vm0, %v1908_v21  ;;  %41 = vst.msk [vmem:[#allocation2 + $0x68] sm:$0xff] %vm27_vm0, %v1908_v21 }
 0x109   :  { %1900 = vrsqrt.f32 %v510_v50  ;;  %v480_v57 = vmul.f32 0.125, %v441_v54  ;;  %v513_v61 = vadd.f32 1e-05, %v481_v53  ;;  %42 = vst.msk [vmem:[#allocation2 + $0x70] sm:$0xff] %vm27_vm0, %v1908_v21  ;;  %43 = vst.msk [vmem:[#allocation2 + $0x78] sm:$0xff] %vm27_vm0, %v1908_v21 }
 0x10a   :  { %v1889_v58 = vpop.eup %1888  ;;  %1902 = vrsqrt.f32 %v511_v45  ;;  %44 = vst.msk [vmem:[#allocation2 + $0x80] sm:$0xff] %vm27_vm0, %v1908_v21  ;;  %45 = vst.msk [vmem:[#allocation2 + $0x88] sm:$0xff] %vm27_vm0, %v1908_v21 }
 0x10b   :  { %v1891_v62 = vpop.eup %1890  ;;  %v512_v1 = vadd.f32 1e-05, %v480_v57  ;;  %1770 = vmatprep.mubr.msk.f32.mxu1 %vm547_vm2, %v1889_v58  ;;  %46 = vst.msk [vmem:[#allocation2 + $0x90] sm:$0xff] %vm27_vm0, %v1908_v21  ;;  %47 = vst.msk [vmem:[#allocation2 + $0x98] sm:$0xff] %vm27_vm0, %v1908_v21 }
 0x10c   :  { %1771 = vmatmul.mubr.msk.f32.gmra.mxu1 %vm547_vm2, %v1891_v62  ;;  %48 = vst.msk [vmem:[#allocation2 + $0xa0] sm:$0xff] %vm27_vm0, %v1908_v21  ;;  %49 = vst.msk [vmem:[#allocation2 + $0xa8] sm:$0xff] %vm27_vm0, %v1908_v21 }
 0x10d   :  { %1904 = vrsqrt.f32 %v512_v1  ;;  %50 = vst.msk [vmem:[#allocation2 + $0xb0] sm:$0xff] %vm27_vm0, %v1908_v21  ;;  %51 = vst.msk [vmem:[#allocation2 + $0xb8] sm:$0xff] %vm27_vm0, %v1908_v21 }
 0x10e   :  { %v1893_v3 = vpop.eup %1892  ;;  %1906 = vrsqrt.f32 %v513_v61  ;;  %52 = vst.msk [vmem:[#allocation2 + $0xc0] sm:$0xff] %vm27_vm0, %v1908_v21  ;;  %53 = vst.msk [vmem:[#allocation2 + $0xc8] sm:$0xff] %vm27_vm0, %v1908_v21 }
 0x10f   :  { %v1895_v7 = vpop.eup %1894  ;;  %1773 = vmatprep.mubr.msk.f32.mxu1 %vm547_vm2, %v1893_v3  ;;  %54 = vst.msk [vmem:[#allocation2 + $0xd0] sm:$0xff] %vm27_vm0, %v1908_v21  ;;  %55 = vst.msk [vmem:[#allocation2 + $0xd8] sm:$0xff] %vm27_vm0, %v1908_v21 }
 0x110   :  { %1774 = vmatmul.mubr.msk.f32.gmra.mxu1 %vm547_vm2, %v1895_v7  ;;  %56 = vst.msk [vmem:[#allocation2 + $0xe0] sm:$0xff] %vm27_vm0, %v1908_v21  ;;  %57 = vst.msk [vmem:[#allocation2 + $0xe8] sm:$0xff] %vm27_vm0, %v1908_v21 }
 0x111   :  { %58 = vst.msk [vmem:[#allocation2 + $0xf0] sm:$0xff] %vm27_vm0, %v1908_v21  ;;  %59 = vst.msk [vmem:[#allocation2 + $0xf8] sm:$0xff] %vm27_vm0, %v1908_v21 }
 0x112   :  { %v1897_v9 = vpop.eup %1896 }
 0x113   :  { %v1899_v12 = vpop.eup %1898  ;;  %1776 = vmatprep.mubr.msk.f32.mxu1 %vm547_vm2, %v1897_v9 }
 0x114   :  { %1777 = vmatmul.mubr.msk.f32.gmra.mxu1 %vm547_vm2, %v1899_v12 }
 0x116   :  { %v1901_v13 = vpop.eup %1900 }
 0x117   :  { %v1903_v16 = vpop.eup %1902  ;;  %1779 = vmatprep.mubr.msk.f32.mxu1 %vm547_vm2, %v1901_v13 }
 0x118   :  { %1780 = vmatmul.mubr.msk.f32.gmra.mxu1 %vm547_vm2, %v1903_v16 }
 0x11a   :  { %v1905_v17 = vpop.eup %1904 }
 0x11b   :  { %v1907_v18 = vpop.eup %1906  ;;  %1782 = vmatprep.mubr.msk.f32.mxu1 %vm547_vm2, %v1905_v17 }
 0x11c   :  { %1783 = vmatmul.mubr.msk.f32.gmra.mxu1 %vm547_vm2, %v1907_v18 }
 0x1a0   :  { %v1739_v22 = vpop.f32.mrf.mxu0 }
 0x1a1   :  { %v874_v8 = vmul.f32 %v1739_v22, %v1963_v5 }
 0x1a2   :  { %v714_v25 = vpop.f32.mrf.mxu0 }
 0x1a3   :  { %v873_v29 = vmul.f32 %v714_v25, %v1953_v2  ;;  %v913_v34 = vmul.f32 %v2299_v26, %v874_v8 }
 0x1a4   :  { %v1742_v30 = vpop.f32.mrf.mxu0 }
 0x1a5   :  { %v912_v33 = vmul.f32 %v2299_v26, %v873_v29  ;;  %v876_v37 = vmul.f32 %v1742_v30, %v1981_v10 }
 0x1a6   :  { %v724_v38 = vpop.f32.mrf.mxu0 }
 0x1a7   :  { %v875_v41 = vmul.f32 %v724_v38, %v1968_v6  ;;  %1793 = vmatprep.mubr.msk.f32.mxu1 %vm27_vm0, %v912_v33  ;;  %v915_v45 = vmul.f32 %v2299_v26, %v876_v37 }
 0x1a8   :  { %v1745_v5 = vpop.f32.mrf.mxu0  ;;  %1794 = vmatmul.mubr.msk.f32.vlgmr.msra.gmra.mxu1 %vm27_vm0, %v913_v34 }
 0x1a9   :  { %v914_v42 = vmul.f32 %v2299_v26, %v875_v41  ;;  %v878_v2 = vmul.f32 %v1745_v5, %v1997_v14 }
 0x1aa   :  { %v734_v46 = vpop.f32.mrf.mxu0 }
 0x1ab   :  { %v877_v49 = vmul.f32 %v734_v46, %v1986_v11  ;;  %1796 = vmatprep.mubr.msk.f32.mxu1 %vm27_vm0, %v914_v42  ;;  %v917_v50 = vmul.f32 %v2299_v26, %v878_v2 }
 0x1ac   :  { %v1748_v10 = vpop.f32.mrf.mxu0  ;;  %1797 = vmatmul.mubr.msk.f32.gmra.mxu1 %vm27_vm0, %v915_v45 }
 0x1ad   :  { %v916_v6 = vmul.f32 %v2299_v26, %v877_v49  ;;  %v880_v53 = vmul.f32 %v1748_v10, %v2016_v19 }
 0x1ae   :  { %v744_v54 = vpop.f32.mrf.mxu0 }
 0x1af   :  { %v879_v57 = vmul.f32 %v744_v54, %v2002_v15  ;;  %1799 = vmatprep.mubr.msk.f32.mxu1 %vm27_vm0, %v916_v6  ;;  %v919_v58 = vmul.f32 %v2299_v26, %v880_v53 }
 0x1b0   :  { %v1751_v14 = vpop.f32.mrf.mxu0  ;;  %1800 = vmatmul.mubr.msk.f32.gmra.mxu1 %vm27_vm0, %v917_v50 }
 0x1b1   :  { %v918_v11 = vmul.f32 %v2299_v26, %v879_v57  ;;  %v882_v61 = vmul.f32 %v1751_v14, %v2032_v23 }
 0x1b2   :  { %v754_v62 = vpop.f32.mrf.mxu0 }
 0x1b3   :  { %v881_v1 = vmul.f32 %v754_v62, %v2021_v20  ;;  %1802 = vmatprep.mubr.msk.f32.mxu1 %vm27_vm0, %v918_v11  ;;  %v921_v3 = vmul.f32 %v2299_v26, %v882_v61 }
 0x1b4   :  { %v1754_v19 = vpop.f32.mrf.mxu0  ;;  %1803 = vmatmul.mubr.msk.f32.gmra.mxu1 %vm27_vm0, %v919_v58 }
 0x1b5   :  { %v920_v15 = vmul.f32 %v2299_v26, %v881_v1  ;;  %v884_v7 = vmul.f32 %v1754_v19, %v2048_v27 }
 0x1b6   :  { %v764_v9 = vpop.f32.mrf.mxu0 }
 0x1b7   :  { %v883_v12 = vmul.f32 %v764_v9, %v2037_v24  ;;  %1805 = vmatprep.mubr.msk.f32.mxu1 %vm27_vm0, %v920_v15  ;;  %v923_v13 = vmul.f32 %v2299_v26, %v884_v7 }
 0x1b8   :  { %v1757_v23 = vpop.f32.mrf.mxu0  ;;  %1806 = vmatmul.mubr.msk.f32.gmra.mxu1 %vm27_vm0, %v921_v3 }
 0x1b9   :  { %v922_v20 = vmul.f32 %v2299_v26, %v883_v12  ;;  %v886_v16 = vmul.f32 %v1757_v23, %v2064_v31 }
 0x1ba   :  { %v774_v17 = vpop.f32.mrf.mxu0 }
 0x1bb   :  { %v885_v18 = vmul.f32 %v774_v17, %v2053_v28  ;;  %1808 = vmatprep.mubr.msk.f32.mxu1 %vm27_vm0, %v922_v20  ;;  %v925_v21 = vmul.f32 %v2299_v26, %v886_v16  ;;  %v945_v20 = vld [vmem:[#allocation2 + $0x8] sm:$0xff]  ;;  %v944_v16 = vld [vmem:[#allocation2] sm:$0xff] }
 0x1bc   :  { %v1760_v27 = vpop.f32.mrf.mxu1  ;;  %1809 = vmatmul.mubr.msk.f32.gmra.mxu1 %vm27_vm0, %v923_v13 }
 0x1bd   :  { %v924_v24 = vmul.f32 %v2299_v26, %v885_v18  ;;  %v888_v22 = vmul.f32 %v1760_v27, %v2080_v35  ;;  %v947_v18 = vld [vmem:[#allocation2 + $0x18] sm:$0xff] }
 0x1be   :  { %v784_v8 = vpop.f32.mrf.mxu1 }
 0x1bf   :  { %v887_v25 = vmul.f32 %v784_v8, %v2069_v32  ;;  %1811 = vmatprep.mubr.msk.f32.mxu1 %vm27_vm0, %v924_v24  ;;  %v927_v29 = vmul.f32 %v2299_v26, %v888_v22  ;;  %v946_v24 = vld [vmem:[#allocation2 + $0x10] sm:$0xff] }
 0x1c0   :  { %v1763_v31 = vpop.f32.mrf.mxu1  ;;  %1812 = vmatmul.mubr.msk.f32.gmra.mxu1 %vm27_vm0, %v925_v21 }
 0x1c1   :  { %v926_v28 = vmul.f32 %v2299_v26, %v887_v25  ;;  %v890_v30 = vmul.f32 %v1763_v31, %v2096_v39  ;;  %v2402_v25 = vld [vmem:[%s2598_s5] ss:$0 sm:$0xff] }
 0x1c2   :  { %v794_v33 = vpop.f32.mrf.mxu1 }
 0x1c3   :  { %v889_v34 = vmul.f32 %v794_v33, %v2085_v36  ;;  %1814 = vmatprep.mubr.msk.f32.mxu1 %vm27_vm0, %v926_v28  ;;  %v929_v37 = vmul.f32 %v2299_v26, %v890_v30  ;;  %v948_v28 = vld [vmem:[#allocation2 + $0x20] sm:$0xff] }
 0x1c4   :  { %v1766_v35 = vpop.f32.mrf.mxu1  ;;  %1815 = vmatmul.mubr.msk.f32.gmra.mxu1 %vm27_vm0, %v927_v29 }
 0x1c5   :  { %v928_v32 = vmul.f32 %v2299_v26, %v889_v34  ;;  %v892_v38 = vmul.f32 %v1766_v35, %v2112_v43  ;;  %v951_v34 = vld [vmem:[#allocation2 + $0x38] sm:$0xff] }
 0x1c6   :  { %v804_v41 = vpop.f32.mrf.mxu1 }
 0x1c7   :  { %v891_v5 = vmul.f32 %v804_v41, %v2101_v40  ;;  %1817 = vmatprep.mubr.msk.f32.mxu1 %vm27_vm0, %v928_v32  ;;  %v931_v42 = vmul.f32 %v2299_v26, %v892_v38  ;;  %v950_v41 = vld [vmem:[#allocation2 + $0x30] sm:$0xff] }
 0x1c8   :  { %v1769_v39 = vpop.f32.mrf.mxu1  ;;  %1818 = vmatmul.mubr.msk.f32.gmra.mxu1 %vm27_vm0, %v929_v37 }
 0x1c9   :  { %v930_v36 = vmul.f32 %v2299_v26, %v891_v5  ;;  %v894_v45 = vmul.f32 %v1769_v39, %v2128_v47 }
 0x1ca   :  { %v814_v2 = vpop.f32.mrf.mxu1 }
 0x1cb   :  { %v893_v46 = vmul.f32 %v814_v2, %v2117_v44  ;;  %1820 = vmatprep.mubr.msk.f32.mxu1 %vm27_vm0, %v930_v36  ;;  %v933_v49 = vmul.f32 %v2299_v26, %v894_v45  ;;  %v953_v45 = vld [vmem:[#allocation2 + $0x48] sm:$0xff] }
 0x1cc   :  { %v1772_v43 = vpop.f32.mrf.mxu1  ;;  %1821 = vmatmul.mubr.msk.f32.gmra.mxu1 %vm27_vm0, %v931_v42 }
 0x1cd   :  { %v932_v40 = vmul.f32 %v2299_v26, %v893_v46  ;;  %v896_v10 = vmul.f32 %v1772_v43, %v2144_v51 }
 0x1ce   :  { %v824_v6 = vpop.f32.mrf.mxu1 }
 0x1cf   :  { %v895_v50 = vmul.f32 %v824_v6, %v2133_v48  ;;  %1823 = vmatprep.mubr.msk.f32.mxu1 %vm27_vm0, %v932_v40  ;;  %v935_v53 = vmul.f32 %v2299_v26, %v896_v10 }
 0x1d0   :  { %v1775_v47 = vpop.f32.mrf.mxu1  ;;  %1824 = vmatmul.mubr.msk.f32.gmra.mxu1 %vm27_vm0, %v933_v49  ;;  %v952_v49 = vld [vmem:[#allocation2 + $0x40] sm:$0xff] }
 0x1d1   :  { %v934_v44 = vmul.f32 %v2299_v26, %v895_v50  ;;  %v898_v54 = vmul.f32 %v1775_v47, %v2160_v55 }
 0x1d2   :  { %v834_v57 = vpop.f32.mrf.mxu1 }
 0x1d3   :  { %v897_v14 = vmul.f32 %v834_v57, %v2149_v52  ;;  %1826 = vmatprep.mubr.msk.f32.mxu1 %vm27_vm0, %v934_v44  ;;  %v937_v11 = vmul.f32 %v2299_v26, %v898_v54  ;;  %v955_v44 = vld [vmem:[#allocation2 + $0x58] sm:$0xff] }
 0x1d4   :  { %v1778_v51 = vpop.f32.mrf.mxu1  ;;  %1827 = vmatmul.mubr.msk.f32.gmra.mxu1 %vm27_vm0, %v935_v53 }
 0x1d5   :  { %v936_v48 = vmul.f32 %v2299_v26, %v897_v14  ;;  %v900_v58 = vmul.f32 %v1778_v51, %v2176_v59  ;;  %v954_v51 = vld [vmem:[#allocation2 + $0x50] sm:$0xff] }
 0x1d6   :  { %v844_v61 = vpop.f32.mrf.mxu1 }
 0x1d7   :  { %v899_v62 = vmul.f32 %v844_v61, %v2165_v56  ;;  %1829 = vmatprep.mubr.msk.f32.mxu1 %vm27_vm0, %v936_v48  ;;  %v939_v1 = vmul.f32 %v2299_v26, %v900_v58 }
 0x1d8   :  { %v1781_v55 = vpop.f32.mrf.mxu1  ;;  %1830 = vmatmul.mubr.msk.f32.gmra.mxu1 %vm27_vm0, %v937_v11 }
 0x1d9   :  { %v938_v52 = vmul.f32 %v2299_v26, %v899_v62  ;;  %v902_v19 = vmul.f32 %v1781_v55, %v2192_v63  ;;  %v957_v62 = vld [vmem:[#allocation2 + $0x68] sm:$0xff] }
 0x1da   :  { %v854_v15 = vpop.f32.mrf.mxu1 }
 0x1db   :  { %v901_v3 = vmul.f32 %v854_v15, %v2181_v60  ;;  %1832 = vmatprep.mubr.msk.f32.mxu1 %vm27_vm0, %v938_v52  ;;  %v941_v7 = vmul.f32 %v2299_v26, %v902_v19  ;;  %v956_v15 = vld [vmem:[#allocation2 + $0x60] sm:$0xff] }
 0x1dc   :  { %v1784_v59 = vpop.f32.mrf.mxu1  ;;  %1833 = vmatmul.mubr.msk.f32.gmra.mxu1 %vm27_vm0, %v939_v1 }
 0x1dd   :  { %v940_v56 = vmul.f32 %v2299_v26, %v901_v3  ;;  %v904_v9 = vmul.f32 %v1784_v59, %v2208_v4 }
 0x1de   :  { %v864_v12 = vpop.f32.mrf.mxu1 }
 0x1df   :  { %v903_v23 = vmul.f32 %v864_v12, %v2197_v0  ;;  %1835 = vmatprep.mubr.msk.f32.mxu1 %vm27_vm0, %v940_v56  ;;  %v943_v63 = vmul.f32 %v2299_v26, %v904_v9  ;;  %v959_v9 = vld [vmem:[#allocation2 + $0x78] sm:$0xff] }
 0x1e0   :  { %1836 = vmatmul.mubr.msk.f32.gmra.mxu1 %vm27_vm0, %v941_v7 }
 0x1e1   :  { %v942_v60 = vmul.f32 %v2299_v26, %v903_v23  ;;  %v949_v26 = vld [vmem:[#allocation2 + $0x28] sm:$0xff] }
 0x1e3   :  { %1838 = vmatprep.mubr.msk.f32.mxu1 %vm27_vm0, %v942_v60 }
 0x1e4   :  { %1839 = vmatmul.mubr.msk.f32.gmra.mxu1 %vm27_vm0, %v943_v63 }
 0x268   :  { %v1795_v13 = vpop.f32.mrf.mxu1 }
 0x269   :  { %v1302_v17 = vadd.f32 %v1795_v13, %v945_v20  ;;  %v958_v20 = vld [vmem:[#allocation2 + $0x70] sm:$0xff] }
 0x26a   :  { %v1142_v4 = vpop.f32.mrf.mxu1 }
 0x26b   :  { %1334 = vst.msk [vmem:[#allocation2 + $0x8] sm:$0xff] %vm27_vm0, %v1302_v17  ;;  %v1301_v0 = vadd.f32 %v1142_v4, %v944_v16 }
 0x26c   :  { %v1798_v27 = vpop.f32.mrf.mxu1 }
 0x26d   :  { %1333 = vst.msk [vmem:[#allocation2] sm:$0xff] %vm27_vm0, %v1301_v0  ;;  %v1304_v21 = vadd.f32 %v1798_v27, %v947_v18  ;;  %v961_v18 = vld [vmem:[#allocation2 + $0x88] sm:$0xff] }
 0x26e   :  { %v1152_v22 = vpop.f32.mrf.mxu1 }
 0x26f   :  { %1336 = vst.msk [vmem:[#allocation2 + $0x18] sm:$0xff] %vm27_vm0, %v1304_v21  ;;  %v1303_v8 = vadd.f32 %v1152_v22, %v946_v24  ;;  %v960_v22 = vld [vmem:[#allocation2 + $0x80] sm:$0xff] }
 0x270   :  { %v1801_v31 = vpop.f32.mrf.mxu1 }
 0x271   :  { %1335 = vst.msk [vmem:[#allocation2 + $0x10] sm:$0xff] %vm27_vm0, %v1303_v8  ;;  %v1306_v29 = vadd.f32 %v1801_v31, %v949_v26 }
 0x272   :  { %v1369_v30 = vld [vmem:[#allocation2 + $0x8] sm:$0xff]  ;;  %v1162_v33 = vpop.f32.mrf.mxu1 }
 0x273   :  { %v1408_v35 = vadd.f32 %v2402_v25, %v1369_v30  ;;  %1338 = vst.msk [vmem:[#allocation2 + $0x28] sm:$0xff] %vm27_vm0, %v1306_v29  ;;  %v1305_v32 = vadd.f32 %v1162_v33, %v948_v28  ;;  %v963_v29 = vld [vmem:[#allocation2 + $0x98] sm:$0xff] }
 0x274   :  { %v1368_v37 = vld [vmem:[#allocation2] sm:$0xff]  ;;  %v1804_v38 = vpop.f32.mrf.mxu1 }
 0x275   :  { %1440 = vst.msk [vmem:[%s2599_s6 + $0x8] sm:$0xff] %vm27_vm0, %v1408_v35  ;;  %v1407_v5 = vadd.f32 %v2402_v25, %v1368_v37  ;;  %1337 = vst.msk [vmem:[#allocation2 + $0x20] sm:$0xff] %vm27_vm0, %v1305_v32  ;;  %v1308_v39 = vadd.f32 %v1804_v38, %v951_v34  ;;  %v962_v32 = vld [vmem:[#allocation2 + $0x90] sm:$0xff] }
 0x276   :  { %v1371_v36 = vld [vmem:[#allocation2 + $0x18] sm:$0xff]  ;;  %v1172_v42 = vpop.f32.mrf.mxu1 }
 0x277   :  { %1439 = vst.msk [vmem:[%s2599_s6] sm:$0xff] %vm27_vm0, %v1407_v5  ;;  %v1410_v2 = vadd.f32 %v2402_v25, %v1371_v36  ;;  %1340 = vst.msk [vmem:[#allocation2 + $0x38] sm:$0xff] %vm27_vm0, %v1308_v39  ;;  %v1307_v46 = vadd.f32 %v1172_v42, %v950_v41  ;;  %v965_v39 = vld [vmem:[#allocation2 + $0xa8] sm:$0xff] }
 0x278   :  { %v1370_v43 = vld [vmem:[#allocation2 + $0x10] sm:$0xff]  ;;  %v1807_v40 = vpop.f32.mrf.mxu1 }
 0x279   :  { %1442 = vst.msk [vmem:[%s2599_s6 + $0x18] sm:$0xff] %vm27_vm0, %v1410_v2  ;;  %v1409_v10 = vadd.f32 %v2402_v25, %v1370_v43  ;;  %1339 = vst.msk [vmem:[#allocation2 + $0x30] sm:$0xff] %vm27_vm0, %v1307_v46  ;;  %v1310_v6 = vadd.f32 %v1807_v40, %v953_v45  ;;  %v964_v46 = vld [vmem:[#allocation2 + $0xa0] sm:$0xff] }
 0x27a   :  { %v1373_v50 = vld [vmem:[#allocation2 + $0x28] sm:$0xff]  ;;  %v1182_v47 = vpop.f32.mrf.mxu1 }
 0x27b   :  { %1441 = vst.msk [vmem:[%s2599_s6 + $0x10] sm:$0xff] %vm27_vm0, %v1409_v10  ;;  %v1412_v53 = vadd.f32 %v2402_v25, %v1373_v50  ;;  %1342 = vst.msk [vmem:[#allocation2 + $0x48] sm:$0xff] %vm27_vm0, %v1310_v6  ;;  %v1309_v54 = vadd.f32 %v1182_v47, %v952_v49  ;;  %v967_v6 = vld [vmem:[#allocation2 + $0xb8] sm:$0xff] }
 0x27c   :  { %v1372_v57 = vld [vmem:[#allocation2 + $0x20] sm:$0xff]  ;;  %v1810_v14 = vpop.f32.mrf.mxu1 }
 0x27d   :  { %1444 = vst.msk [vmem:[%s2599_s6 + $0x28] sm:$0xff] %vm27_vm0, %v1412_v53  ;;  %v1411_v48 = vadd.f32 %v2402_v25, %v1372_v57  ;;  %1341 = vst.msk [vmem:[#allocation2 + $0x40] sm:$0xff] %vm27_vm0, %v1309_v54  ;;  %v1312_v11 = vadd.f32 %v1810_v14, %v955_v44  ;;  %v966_v54 = vld [vmem:[#allocation2 + $0xb0] sm:$0xff] }
 0x27e   :  { %v1375_v58 = vld [vmem:[#allocation2 + $0x38] sm:$0xff]  ;;  %v1192_v61 = vpop.f32.mrf.mxu1 }
 0x27f   :  { %1443 = vst.msk [vmem:[%s2599_s6 + $0x20] sm:$0xff] %vm27_vm0, %v1411_v48  ;;  %v1414_v55 = vadd.f32 %v2402_v25, %v1375_v58  ;;  %1344 = vst.msk [vmem:[#allocation2 + $0x58] sm:$0xff] %vm27_vm0, %v1312_v11  ;;  %v1311_v52 = vadd.f32 %v1192_v61, %v954_v51  ;;  %v969_v11 = vld [vmem:[#allocation2 + $0xc8] sm:$0xff] }
 0x280   :  { %v1374_v1 = vld [vmem:[#allocation2 + $0x30] sm:$0xff]  ;;  %v1813_v19 = vpop.f32.mrf.mxu1 }
 0x281   :  { %1446 = vst.msk [vmem:[%s2599_s6 + $0x38] sm:$0xff] %vm27_vm0, %v1414_v55  ;;  %v1413_v3 = vadd.f32 %v2402_v25, %v1374_v1  ;;  %1343 = vst.msk [vmem:[#allocation2 + $0x50] sm:$0xff] %vm27_vm0, %v1311_v52  ;;  %v1314_v59 = vadd.f32 %v1813_v19, %v957_v62  ;;  %v968_v52 = vld [vmem:[#allocation2 + $0xc0] sm:$0xff] }
 0x282   :  { %v1377_v56 = vld [vmem:[#allocation2 + $0x48] sm:$0xff]  ;;  %v1202_v7 = vpop.f32.mrf.mxu1 }
 0x283   :  { %1445 = vst.msk [vmem:[%s2599_s6 + $0x30] sm:$0xff] %vm27_vm0, %v1413_v3  ;;  %v1416_v12 = vadd.f32 %v2402_v25, %v1377_v56  ;;  %1346 = vst.msk [vmem:[#allocation2 + $0x68] sm:$0xff] %vm27_vm0, %v1314_v59  ;;  %v1313_v23 = vadd.f32 %v1202_v7, %v956_v15  ;;  %v971_v59 = vld [vmem:[#allocation2 + $0xd8] sm:$0xff] }
 0x284   :  { %v1376_v60 = vld [vmem:[#allocation2 + $0x40] sm:$0xff]  ;;  %v1816_v63 = vpop.f32.mrf.mxu1 }
 0x285   :  { %1448 = vst.msk [vmem:[%s2599_s6 + $0x48] sm:$0xff] %vm27_vm0, %v1416_v12  ;;  %v1415_v13 = vadd.f32 %v2402_v25, %v1376_v60  ;;  %1345 = vst.msk [vmem:[#allocation2 + $0x60] sm:$0xff] %vm27_vm0, %v1313_v23  ;;  %v1316_v16 = vadd.f32 %v1816_v63, %v959_v9  ;;  %v970_v23 = vld [vmem:[#allocation2 + $0xd0] sm:$0xff] }
 0x286   :  { %v1379_v17 = vld [vmem:[#allocation2 + $0x58] sm:$0xff]  ;;  %v1212_v4 = vpop.f32.mrf.mxu1 }
 0x287   :  { %1447 = vst.msk [vmem:[%s2599_s6 + $0x40] sm:$0xff] %vm27_vm0, %v1415_v13  ;;  %v1418_v0 = vadd.f32 %v2402_v25, %v1379_v17  ;;  %1348 = vst.msk [vmem:[#allocation2 + $0x78] sm:$0xff] %vm27_vm0, %v1316_v16  ;;  %v1315_v27 = vadd.f32 %v1212_v4, %v958_v20  ;;  %v973_v16 = vld [vmem:[#allocation2 + $0xe8] sm:$0xff] }
 0x288   :  { %v1378_v24 = vld [vmem:[#allocation2 + $0x50] sm:$0xff]  ;;  %v1819_v21 = vpop.f32.mrf.mxu1 }
 0x289   :  { %1450 = vst.msk [vmem:[%s2599_s6 + $0x58] sm:$0xff] %vm27_vm0, %v1418_v0  ;;  %v1417_v26 = vadd.f32 %v2402_v25, %v1378_v24  ;;  %1347 = vst.msk [vmem:[#allocation2 + $0x70] sm:$0xff] %vm27_vm0, %v1315_v27  ;;  %v1318_v8 = vadd.f32 %v1819_v21, %v961_v18  ;;  %v972_v27 = vld [vmem:[#allocation2 + $0xe0] sm:$0xff] }
 0x28a   :  { %v1381_v31 = vld [vmem:[#allocation2 + $0x68] sm:$0xff]  ;;  %v1222_v28 = vpop.f32.mrf.mxu1 }
 0x28b   :  { %1449 = vst.msk [vmem:[%s2599_s6 + $0x50] sm:$0xff] %vm27_vm0, %v1417_v26  ;;  %v1420_v30 = vadd.f32 %v2402_v25, %v1381_v31  ;;  %1350 = vst.msk [vmem:[#allocation2 + $0x88] sm:$0xff] %vm27_vm0, %v1318_v8  ;;  %v1317_v33 = vadd.f32 %v1222_v28, %v960_v22  ;;  %v975_v8 = vld [vmem:[#allocation2 + $0xf8] sm:$0xff] }
 0x28c   :  { %v1380_v34 = vld [vmem:[#allocation2 + $0x60] sm:$0xff]  ;;  %v1822_v35 = vpop.f32.mrf.mxu1 }
 0x28d   :  { %1452 = vst.msk [vmem:[%s2599_s6 + $0x68] sm:$0xff] %vm27_vm0, %v1420_v30  ;;  %v1419_v37 = vadd.f32 %v2402_v25, %v1380_v34  ;;  %1349 = vst.msk [vmem:[#allocation2 + $0x80] sm:$0xff] %vm27_vm0, %v1317_v33  ;;  %v1320_v38 = vadd.f32 %v1822_v35, %v963_v29  ;;  %v974_v33 = vld [vmem:[#allocation2 + $0xf0] sm:$0xff] }
 0x28e   :  { %v1383_v41 = vld [vmem:[#allocation2 + $0x78] sm:$0xff]  ;;  %v1232_v5 = vpop.f32.mrf.mxu1 }
 0x28f   :  { %1451 = vst.msk [vmem:[%s2599_s6 + $0x60] sm:$0xff] %vm27_vm0, %v1419_v37  ;;  %v1422_v36 = vadd.f32 %v2402_v25, %v1383_v41  ;;  %1352 = vst.msk [vmem:[#allocation2 + $0x98] sm:$0xff] %vm27_vm0, %v1320_v38  ;;  %v1319_v42 = vadd.f32 %v1232_v5, %v962_v32 }
 0x290   :  { %v1382_v45 = vld [vmem:[#allocation2 + $0x70] sm:$0xff]  ;;  %v1825_v2 = vpop.f32.mrf.mxu1 }
 0x291   :  { %1454 = vst.msk [vmem:[%s2599_s6 + $0x78] sm:$0xff] %vm27_vm0, %v1422_v36  ;;  %v1421_v43 = vadd.f32 %v2402_v25, %v1382_v45  ;;  %1351 = vst.msk [vmem:[#allocation2 + $0x90] sm:$0xff] %vm27_vm0, %v1319_v42  ;;  %v1322_v40 = vadd.f32 %v1825_v2, %v965_v39 }
 0x292   :  { %v1385_v49 = vld [vmem:[#allocation2 + $0x88] sm:$0xff]  ;;  %v1242_v10 = vpop.f32.mrf.mxu1 }
 0x293   :  { %1453 = vst.msk [vmem:[%s2599_s6 + $0x70] sm:$0xff] %vm27_vm0, %v1421_v43  ;;  %v1424_v50 = vadd.f32 %v2402_v25, %v1385_v49  ;;  %1354 = vst.msk [vmem:[#allocation2 + $0xa8] sm:$0xff] %vm27_vm0, %v1322_v40  ;;  %v1321_v47 = vadd.f32 %v1242_v10, %v964_v46 }
 0x294   :  { %v1384_v44 = vld [vmem:[#allocation2 + $0x80] sm:$0xff]  ;;  %v1828_v53 = vpop.f32.mrf.mxu1 }
 0x295   :  { %1456 = vst.msk [vmem:[%s2599_s6 + $0x88] sm:$0xff] %vm27_vm0, %v1424_v50  ;;  %v1423_v57 = vadd.f32 %v2402_v25, %v1384_v44  ;;  %1353 = vst.msk [vmem:[#allocation2 + $0xa0] sm:$0xff] %vm27_vm0, %v1321_v47  ;;  %v1324_v14 = vadd.f32 %v1828_v53, %v967_v6 }
 0x296   :  { %v1387_v51 = vld [vmem:[#allocation2 + $0x98] sm:$0xff]  ;;  %v1252_v48 = vpop.f32.mrf.mxu1 }
 0x297   :  { %1455 = vst.msk [vmem:[%s2599_s6 + $0x80] sm:$0xff] %vm27_vm0, %v1423_v57  ;;  %v1426_v58 = vadd.f32 %v2402_v25, %v1387_v51  ;;  %1356 = vst.msk [vmem:[#allocation2 + $0xb8] sm:$0xff] %vm27_vm0, %v1324_v14  ;;  %v1323_v61 = vadd.f32 %v1252_v48, %v966_v54 }
 0x298   :  { %v1386_v62 = vld [vmem:[#allocation2 + $0x90] sm:$0xff]  ;;  %v1831_v55 = vpop.f32.mrf.mxu1 }
 0x299   :  { %1458 = vst.msk [vmem:[%s2599_s6 + $0x98] sm:$0xff] %vm27_vm0, %v1426_v58  ;;  %v1425_v1 = vadd.f32 %v2402_v25, %v1386_v62  ;;  %1355 = vst.msk [vmem:[#allocation2 + $0xb0] sm:$0xff] %vm27_vm0, %v1323_v61  ;;  %v1326_v19 = vadd.f32 %v1831_v55, %v969_v11 }
 0x29a   :  { %v1389_v15 = vld [vmem:[#allocation2 + $0xa8] sm:$0xff]  ;;  %v1262_v3 = vpop.f32.mrf.mxu1 }
 0x29b   :  { %1457 = vst.msk [vmem:[%s2599_s6 + $0x90] sm:$0xff] %vm27_vm0, %v1425_v1  ;;  %v1428_v56 = vadd.f32 %v2402_v25, %v1389_v15  ;;  %1358 = vst.msk [vmem:[#allocation2 + $0xc8] sm:$0xff] %vm27_vm0, %v1326_v19  ;;  %v1325_v7 = vadd.f32 %v1262_v3, %v968_v52 }
 0x29c   :  { %v1388_v9 = vld [vmem:[#allocation2 + $0xa0] sm:$0xff]  ;;  %v1834_v12 = vpop.f32.mrf.mxu1 }
 0x29d   :  { %1460 = vst.msk [vmem:[%s2599_s6 + $0xa8] sm:$0xff] %vm27_vm0, %v1428_v56  ;;  %v1427_v60 = vadd.f32 %v2402_v25, %v1388_v9  ;;  %1357 = vst.msk [vmem:[#allocation2 + $0xc0] sm:$0xff] %vm27_vm0, %v1325_v7  ;;  %v1328_v63 = vadd.f32 %v1834_v12, %v971_v59 }
 0x29e   :  { %v1391_v20 = vld [vmem:[#allocation2 + $0xb8] sm:$0xff]  ;;  %v1272_v13 = vpop.f32.mrf.mxu1 }
 0x29f   :  { %1459 = vst.msk [vmem:[%s2599_s6 + $0xa0] sm:$0xff] %vm27_vm0, %v1427_v60  ;;  %v1430_v17 = vadd.f32 %v2402_v25, %v1391_v20  ;;  %1360 = vst.msk [vmem:[#allocation2 + $0xd8] sm:$0xff] %vm27_vm0, %v1328_v63  ;;  %v1327_v4 = vadd.f32 %v1272_v13, %v970_v23 }
 0x2a0   :  { %v1390_v18 = vld [vmem:[#allocation2 + $0xb0] sm:$0xff]  ;;  %v1837_v0 = vpop.f32.mrf.mxu1 }
 0x2a1   :  { %1462 = vst.msk [vmem:[%s2599_s6 + $0xb8] sm:$0xff] %vm27_vm0, %v1430_v17  ;;  %v1429_v24 = vadd.f32 %v2402_v25, %v1390_v18  ;;  %1359 = vst.msk [vmem:[#allocation2 + $0xd0] sm:$0xff] %vm27_vm0, %v1327_v4  ;;  %v1330_v21 = vadd.f32 %v1837_v0, %v973_v16 }
 0x2a2   :  { %v1393_v22 = vld [vmem:[#allocation2 + $0xc8] sm:$0xff]  ;;  %v1282_v26 = vpop.f32.mrf.mxu1 }
 0x2a3   :  { %1461 = vst.msk [vmem:[%s2599_s6 + $0xb0] sm:$0xff] %vm27_vm0, %v1429_v24  ;;  %v1432_v31 = vadd.f32 %v2402_v25, %v1393_v22  ;;  %1362 = vst.msk [vmem:[#allocation2 + $0xe8] sm:$0xff] %vm27_vm0, %v1330_v21  ;;  %v1329_v28 = vadd.f32 %v1282_v26, %v972_v27 }
 0x2a4   :  { %v1392_v29 = vld [vmem:[#allocation2 + $0xc0] sm:$0xff]  ;;  %v1840_v30 = vpop.f32.mrf.mxu1 }
 0x2a5   :  { %1464 = vst.msk [vmem:[%s2599_s6 + $0xc8] sm:$0xff] %vm27_vm0, %v1432_v31  ;;  %v1431_v34 = vadd.f32 %v2402_v25, %v1392_v29  ;;  %1361 = vst.msk [vmem:[#allocation2 + $0xe0] sm:$0xff] %vm27_vm0, %v1329_v28  ;;  %v1332_v35 = vadd.f32 %v1840_v30, %v975_v8 }
 0x2a6   :  { %v1395_v32 = vld [vmem:[#allocation2 + $0xd8] sm:$0xff]  ;;  %v1292_v37 = vpop.f32.mrf.mxu1 }
 0x2a7   :  { %1463 = vst.msk [vmem:[%s2599_s6 + $0xc0] sm:$0xff] %vm27_vm0, %v1431_v34  ;;  %v1434_v38 = vadd.f32 %v2402_v25, %v1395_v32  ;;  %1364 = vst.msk [vmem:[#allocation2 + $0xf8] sm:$0xff] %vm27_vm0, %v1332_v35  ;;  %v1331_v41 = vadd.f32 %v1292_v37, %v974_v33 }
 0x2a8   :  { %v1394_v5 = vld [vmem:[#allocation2 + $0xd0] sm:$0xff] }
 0x2a9   :  { %1466 = vst.msk [vmem:[%s2599_s6 + $0xd8] sm:$0xff] %vm27_vm0, %v1434_v38  ;;  %v1433_v39 = vadd.f32 %v2402_v25, %v1394_v5  ;;  %1363 = vst.msk [vmem:[#allocation2 + $0xf0] sm:$0xff] %vm27_vm0, %v1331_v41 }
 0x2aa   :  { %v1397_v36 = vld [vmem:[#allocation2 + $0xe8] sm:$0xff] }
 0x2ab   :  { %1465 = vst.msk [vmem:[%s2599_s6 + $0xd0] sm:$0xff] %vm27_vm0, %v1433_v39  ;;  %v1436_v42 = vadd.f32 %v2402_v25, %v1397_v36 }
 0x2ac   :  { %v1396_v45 = vld [vmem:[#allocation2 + $0xe0] sm:$0xff] }
 0x2ad   :  { %1468 = vst.msk [vmem:[%s2599_s6 + $0xe8] sm:$0xff] %vm27_vm0, %v1436_v42  ;;  %v1435_v2 = vadd.f32 %v2402_v25, %v1396_v45 }
 0x2ae   :  { %v1399_v46 = vld [vmem:[#allocation2 + $0xf8] sm:$0xff] }
 0x2af   :  { %1467 = vst.msk [vmem:[%s2599_s6 + $0xe0] sm:$0xff] %vm27_vm0, %v1435_v2  ;;  %v1438_v43 = vadd.f32 %v2402_v25, %v1399_v46 }
 0x2b0   :  { %v1398_v40 = vld [vmem:[#allocation2 + $0xf0] sm:$0xff] }
 0x2b1   :  { %1470 = vst.msk [vmem:[%s2599_s6 + $0xf8] sm:$0xff] %vm27_vm0, %v1438_v43  ;;  %v1437_v49 = vadd.f32 %v2402_v25, %v1398_v40 }
 0x2b3   :  { %1469 = vst.msk [vmem:[%s2599_s6 + $0xf0] sm:$0xff] %vm27_vm0, %v1437_v49 }

</bundles_post_ra>
